<compile_context>
chip_gen: v5e
topology: v5e:2x2
jax: 0.10.0
libtpu: 0.0.40
codegen_flags: <defaults>
</compile_context>

<pallas_src>
import functools

import jax
import jax.numpy as jnp
from jax import lax
from jax.experimental import pallas as pl
from jax.experimental.pallas import tpu as pltpu

LANE = 128


def _round_up(v, m):
    return ((v + m - 1) // m) * m


def get_same_padding(kernel_size, dilation):
    kernel_size = kernel_size + (kernel_size - 1) * (dilation - 1)
    return (kernel_size - 1) // 2


def _apply_act(v, kind, neg_slope):
    if kind == "relu":
        return jnp.maximum(v, jnp.asarray(0, v.dtype))
    if kind in ("leakyrelu", "prelu"):
        # TODO(synk): PReLU uses a learned slope; at init (slope=neg_slope) it
        # equals LeakyReLU, which is what is implemented here.
        return jnp.where(v >= 0, v, jnp.asarray(neg_slope, v.dtype) * v)
    return v


def _vmem_limit_bytes():
    cap = 64 * 1024 * 1024
    try:
        cap = int(pltpu.get_tpu_info().vmem_capacity_bytes)
    except Exception:  # pragma: no cover - conservative fallback
        pass
    # ~96 MiB on 128 MiB parts (v5e/v6e), ~48 MiB on 64 MiB v7x.
    return max(32 * 1024 * 1024, min(100 * 1024 * 1024, (cap * 3) // 4))


def _block_vmem_bytes(shape, dtype):
    """Rough VMEM footprint of a block (last dim -> 128 lanes, 2nd-last -> 8)."""
    s = list(shape)
    if len(s) >= 1:
        s[-1] = _round_up(s[-1], LANE)
    if len(s) >= 2:
        s[-2] = _round_up(s[-2], 8)
    n = 1
    for d in s:
        n *= int(d)
    return n * jnp.dtype(dtype).itemsize


# ---------------------------------------------------------------------------
# Pallas kernel: in-kernel im2col + one MXU matmul + bias + activation
# ---------------------------------------------------------------------------
def _fused_conv_kernel(x_ref, w_ref, b_ref, o_ref, slab_ref, *,
                       kh, kw, stride, dilation, oh, owp, cin,
                       chunk, act, neg_slope, pre_act):
    # x_ref   : (1, Hp, Wpp, Cin)   zero-padded input image (NHWC)
    # w_ref   : (Kp, CoutP)         flattened weights, pad rows are zero
    # b_ref   : (1, CoutP)          f32 bias (zeros when bias=False)
    # o_ref   : (1, OH, OWp, CoutP)
    # slab_ref: (chunk, OWp, Kp)    VMEM scratch -- on-the-fly im2col slab
    kp, coutp = w_ref.shape
    k_real = kh * kw * cin
    if kp > k_real:
        # Keep the contraction-pad columns zero (scratch is uninitialized and
        # the taps never overwrite these columns).
        slab_ref[:, :, k_real:] = jnp.zeros((chunk, owp, kp - k_real),
                                            slab_ref.dtype)

    w = w_ref[...]
    b = b_ref[...].astype(jnp.float32)

    for r0 in range(0, oh, chunk):
        rows = min(chunk, oh - r0)
        m = rows * owp
        # Gather the kh*kw taps of this output-row chunk into the slab.
        for i in range(kh):
            h0 = r0 * stride + i * dilation
            for j in range(kw):
                w0 = j * dilation
                c0 = (i * kw + j) * cin
                if stride == 1:
                    t = x_ref[0, h0:h0 + rows, w0:w0 + owp, :]
                else:
                    t = x_ref[0, pl.ds(h0, rows, stride),
                              pl.ds(w0, owp, stride), :]
                slab_ref[0:rows, :, c0:c0 + cin] = t

        slab = slab_ref[0:rows].reshape(m, kp)   # layout-preserving (owp%8==0)
        if pre_act is not None:
            # NAC mode: act before conv.  act(0) == 0 for relu/leaky/prelu, so
            # acting on the zero-padded slab is exact.
            slab = _apply_act(slab, pre_act, neg_slope)

        acc = jnp.dot(slab, w, preferred_element_type=jnp.float32)
        acc = acc + b                            # (1, CoutP) broadcast
        if act is not None:                      # CNA post-activation
            acc = _apply_act(acc, act, neg_slope)
        o_ref[0, r0:r0 + rows, :, :] = (
            acc.reshape(rows, owp, coutp).astype(o_ref.dtype))


def _conv_pallas(x_pad, w_flat, b_pad, *, out_dtype, kh, kw, stride, dilation,
                 oh, owp, cin, act, neg_slope, pre_act):
    n, hp, wpp, _cin = x_pad.shape
    kp, coutp = w_flat.shape

    # Inner row-chunk: keep the matmul M = chunk*OWp as large as the (~4 MiB)
    # slab budget allows -- fewer, deeper MXU calls instead of tiny row tiles.
    slab_cap = 4 * 1024 * 1024
    chunk = max(1, min(oh, slab_cap // max(owp * kp * 4, 1)))

    vmem_limit = _vmem_limit_bytes()
    est = (2 * _block_vmem_bytes((1, hp, wpp, _cin), x_pad.dtype)      # input x2
           + 2 * _block_vmem_bytes((1, oh, owp, coutp), out_dtype)     # output x2
           + 2 * _block_vmem_bytes((kp, coutp), w_flat.dtype)          # weights x2
           + _block_vmem_bytes((chunk, owp, kp), x_pad.dtype)          # slab
           + _block_vmem_bytes((chunk * owp, coutp), jnp.float32))     # acc
    if est > (vmem_limit * 7) // 10:
        # TODO(synk): add a halo'd row-band path (manual DMA / pl.Element) for
        # images too large for the whole-image-per-step VMEM plan.
        raise NotImplementedError(
            f"CommonConv Pallas path: image too large for whole-image VMEM "
            f"plan (est {est} B > budget)")

    kern = functools.partial(
        _fused_conv_kernel, kh=kh, kw=kw, stride=stride, dilation=dilation,
        oh=oh, owp=owp, cin=cin, chunk=chunk, act=act, neg_slope=neg_slope,
        pre_act=pre_act)

    # TODO(synk): for very large Cin*Cout layers, single-buffer the weight
    # BlockSpec (pipeline_mode=pl.Buffered(1)) to halve its VMEM footprint.
    return pl.pallas_call(
        kern,
        out_shape=jax.ShapeDtypeStruct((n, oh, owp, coutp), out_dtype),
        grid=(n,),
        in_specs=[
            pl.BlockSpec((1, hp, wpp, _cin), lambda b: (b, 0, 0, 0)),
            pl.BlockSpec((kp, coutp), lambda b: (0, 0)),
            pl.BlockSpec((1, coutp), lambda b: (0, 0)),
        ],
        out_specs=pl.BlockSpec((1, oh, owp, coutp), lambda b: (b, 0, 0, 0)),
        scratch_shapes=[pltpu.VMEM((chunk, owp, kp), x_pad.dtype)],
        compiler_params=pltpu.CompilerParams(
            dimension_semantics=("parallel",),
            vmem_limit_bytes=vmem_limit),
    )(x_pad, w_flat, b_pad)


# ---------------------------------------------------------------------------
# Wrapper-side glue
# ---------------------------------------------------------------------------
def prepare_params(w_oihw, b=None):
    """One-time weight prep: (Cout,Cin,KH,KW) -> (Kp, CoutP) with
    K = KH*KW*Cin and Cout both zero-padded to multiples of 128."""
    cout, cin, kh, kw = w_oihw.shape
    k = kh * kw * cin
    kp = _round_up(k, LANE)
    coutp = _round_up(cout, LANE)
    w_flat = jnp.transpose(w_oihw, (2, 3, 1, 0)).reshape(k, cout)
    w_flat = jnp.pad(w_flat.astype(jnp.float32),
                     ((0, kp - k), (0, coutp - cout)))
    if b is None:
        b = jnp.zeros((cout,), jnp.float32)
    b_pad = jnp.pad(b.astype(jnp.float32), (0, coutp - cout)).reshape(1, coutp)
    return {"w_flat": w_flat, "b_pad": b_pad}


def common_conv_forward(prepped, x, *, out_nc, kernel_size, stride=1,
                        dilation=1, groups=1, pad_type="same", act_type="relu",
                        norm_type=None, mode="CNA", neg_slope=0.2,
                        compute_dtype=jnp.bfloat16, input_format="NCHW"):
    """CommonConv forward.  x: (N,Cin,H,W) NCHW (default) -> (N,Cout,OH,OW)."""
    mode = mode.upper()
    act = (act_type or "").lower() or None
    if act is not None and act not in ("relu", "leakyrelu", "prelu"):
        raise NotImplementedError(f"activation layer [{act}] is not found")
    if mode not in ("CNA", "NAC"):
        raise NotImplementedError(f"convolution mode [{mode}] is not found")
    if groups != 1:
        # TODO(synk): grouped convolution (groups > 1) not implemented.
        raise NotImplementedError("groups > 1 not supported")
    if norm_type:
        # TODO(synk): batchnorm/instancenorm not fused into the Pallas path.
        raise NotImplementedError("norm_type not supported in this kernel")

    if input_format == "NCHW":
        # TODO(synk): keep activations NHWC across layers to drop this relayout.
        x_nhwc = jnp.transpose(x, (0, 2, 3, 1))
    elif input_format == "NHWC":
        x_nhwc = x
    else:
        raise NotImplementedError(f"input_format [{input_format}]")
    out_dtype = x.dtype
    x_nhwc = x_nhwc.astype(compute_dtype)

    n, h, w_in, cin = x_nhwc.shape
    k = kernel_size
    if pad_type == "same":
        pad = get_same_padding(k, dilation)
    elif pad_type == "zero":
        pad = 0   # matches the reference module: pad_type 'zero' -> Conv2d(padding=0)
    else:
        raise NotImplementedError(f"padding type [{pad_type}] is not found")

    eff_k = dilation * (k - 1) + 1
    oh = (h + 2 * pad - eff_k) // stride + 1
    ow = (w_in + 2 * pad - eff_k) // stride + 1

    # Sublane-aligned output width (8 for f32, 16 for bf16).
    sub = 8 * max(1, 4 // jnp.dtype(compute_dtype).itemsize)
    owp = _round_up(ow, sub)
    need_w = (owp - 1) * stride + eff_k
    extra_w = max(0, need_w - (w_in + 2 * pad))
    x_pad = jnp.pad(x_nhwc, ((0, 0), (pad, pad), (pad, pad + extra_w), (0, 0)))

    w_flat = prepped["w_flat"].astype(compute_dtype)
    b_pad = prepped["b_pad"]                       # stays f32 for the epilogue

    post_act = act if mode == "CNA" else None
    pre_act = act if mode == "NAC" else None
    out_p = _conv_pallas(x_pad, w_flat, b_pad, out_dtype=out_dtype,
                         kh=k, kw=k, stride=stride, dilation=dilation,
                         oh=oh, owp=owp, cin=cin, act=post_act,
                         neg_slope=neg_slope, pre_act=pre_act)
    out = out_p[:, :, :ow, :out_nc]                # drop W / Cout padding
    if input_format == "NCHW":
        out = jnp.transpose(out, (0, 3, 1, 2))
    return out


# ---------------------------------------------------------------------------
# Pure-JAX (lax) reference for verification
# ---------------------------------------------------------------------------
def reference_forward(w, b, x, *, out_nc=None, kernel_size=3, stride=1,
                      dilation=1, groups=1, pad_type="same", act_type="relu",
                      norm_type=None, mode="CNA", neg_slope=0.2):
    del out_nc, norm_type
    pad = get_same_padding(kernel_size, dilation) if pad_type == "same" else 0
    a = (act_type or "").lower()

    def act(v):
        if a == "relu":
            return jax.nn.relu(v)
        if a in ("leakyrelu", "prelu"):
            return jnp.where(v >= 0, v, neg_slope * v)
        return v

    if mode.upper() == "NAC":
        x = act(x)
    y = lax.conv_general_dilated(
        x, w, (stride, stride), ((pad, pad), (pad, pad)),
        rhs_dilation=(dilation, dilation),
        dimension_numbers=("NCHW", "OIHW", "NCHW"),
        feature_group_count=groups,
        precision=lax.Precision.HIGHEST)
    if b is not None:
        y = y + b[None, :, None, None]
    if mode.upper() == "CNA":
        y = act(y)
    return y


if __name__ == "__main__":
    key = jax.random.PRNGKey(0)
    k_w, k_b, k_x = jax.random.split(key, 3)

    in_nc, out_nc, ksize = 8, 16, 3
    N, H, W = 2, 16, 16
    cfg = dict(out_nc=out_nc, kernel_size=ksize, stride=1, dilation=1,
               groups=1, pad_type="same", act_type="relu",
               norm_type=None, mode="CNA")

    w = 0.1 * jax.random.normal(k_w, (out_nc, in_nc, ksize, ksize), jnp.float32)
    b = 0.1 * jax.random.normal(k_b, (out_nc,), jnp.float32)
    x = jax.random.normal(k_x, (N, in_nc, H, W), jnp.float32)

    prepped = prepare_params(w, b)                       # one-time weight prep
    ref = jax.block_until_ready(reference_forward(w, b, x, **cfg))

    # f32 compute path: tight check against the lax reference.
    fwd_f32 = jax.jit(functools.partial(common_conv_forward,
                                        compute_dtype=jnp.float32, **cfg))
    out32 = jax.block_until_ready(fwd_f32(prepped, x))
    assert out32.shape == (N, out_nc, H, W), out32.shape
    err32 = float(jnp.max(jnp.abs(out32 - ref)))
    assert err32 < 1e-2, f"f32 max abs err {err32}"

    # bf16 compute path (the inference default): looser check.
    fwd_bf16 = jax.jit(functools.partial(common_conv_forward,
                                         compute_dtype=jnp.bfloat16, **cfg))
    out16 = jax.block_until_ready(fwd_bf16(prepped, x))
    assert out16.shape == (N, out_nc, H, W), out16.shape
    err16 = float(jnp.max(jnp.abs(out16 - ref)))
    assert err16 < 1e-1, f"bf16 max abs err {err16}"

    print("KERNEL_OK")
</pallas_src>

<mosaic_0001>
module attributes {stable_mosaic.version = 11 : i64} {
  func.func @_fused_conv_kernel(%arg0: i32, %arg1: memref<1x18x18x8xf32, #tpu.memory_space<vmem>>, %arg2: memref<128x128xf32, #tpu.memory_space<vmem>>, %arg3: memref<1x128xf32, #tpu.memory_space<vmem>>, %arg4: memref<1x16x16x128xf32, #tpu.memory_space<vmem>>, %arg5: memref<16x16x128xf32, #tpu.memory_space<vmem>>) attributes {dimension_semantics = [#tpu.dimension_semantics<parallel>], iteration_bounds = array<i64: 2>, scalar_prefetch = 0 : i64, scratch_operands = 1 : i64, tpu.core_type = #tpu.core_type<tc>, window_params = [{transform_indices = @transform_0, window_bounds = array<i64: 1, 18, 18, 8>}, {pipeline_mode = #tpu.pipeline_mode<synchronous>, transform_indices = @transform_1, window_bounds = array<i64: 128, 128>}, {pipeline_mode = #tpu.pipeline_mode<synchronous>, transform_indices = @transform_2, window_bounds = array<i64: 1, 128>}, {transform_indices = @transform_3, window_bounds = array<i64: 1, 16, 16, 128>}]} {
    %cst = arith.constant 0.000000e+00 : f32
    %0 = vector.broadcast %cst : f32 to vector<16x16x56xf32>
    %c0 = arith.constant 0 : index
    %c0_0 = arith.constant 0 : index
    %c72 = arith.constant 72 : index
    %1 = vector.load %arg5[%c0, %c0_0, %c72] : memref<16x16x128xf32, #tpu.memory_space<vmem>>, vector<16x16x56xf32>
    tpu.vector_store %arg5[%c0, %c0_0, %c72], %0 {strides = array<i32>} : memref<16x16x128xf32, #tpu.memory_space<vmem>>, vector<16x16x56xf32>,
    %c0_1 = arith.constant 0 : index
    %c0_2 = arith.constant 0 : index
    %2 = vector.load %arg2[%c0_1, %c0_2] : memref<128x128xf32, #tpu.memory_space<vmem>>, vector<128x128xf32>
    %c0_3 = arith.constant 0 : index
    %c0_4 = arith.constant 0 : index
    %3 = vector.load %arg3[%c0_3, %c0_4] : memref<1x128xf32, #tpu.memory_space<vmem>>, vector<1x128xf32>
    %c0_5 = arith.constant 0 : index
    %c0_6 = arith.constant 0 : index
    %c0_7 = arith.constant 0 : index
    %c0_8 = arith.constant 0 : index
    %4 = vector.load %arg1[%c0_5, %c0_6, %c0_7, %c0_8] : memref<1x18x18x8xf32, #tpu.memory_space<vmem>>, vector<1x16x16x8xf32>
    %5 = vector.shape_cast %4 : vector<1x16x16x8xf32> to vector<16x16x8xf32>
    %c0_9 = arith.constant 0 : index
    %c0_10 = arith.constant 0 : index
    %c0_11 = arith.constant 0 : index
    %6 = vector.load %arg5[%c0_9, %c0_10, %c0_11] : memref<16x16x128xf32, #tpu.memory_space<vmem>>, vector<16x16x8xf32>
    tpu.vector_store %arg5[%c0_9, %c0_10, %c0_11], %5 {strides = array<i32>} : memref<16x16x128xf32, #tpu.memory_space<vmem>>, vector<16x16x8xf32>,
    %c0_12 = arith.constant 0 : index
    %c0_13 = arith.constant 0 : index
    %c1 = arith.constant 1 : index
    %c0_14 = arith.constant 0 : index
    %7 = vector.load %arg1[%c0_12, %c0_13, %c1, %c0_14] : memref<1x18x18x8xf32, #tpu.memory_space<vmem>>, vector<1x16x16x8xf32>
    %8 = vector.shape_cast %7 : vector<1x16x16x8xf32> to vector<16x16x8xf32>
    %c0_15 = arith.constant 0 : index
    %c0_16 = arith.constant 0 : index
    %c8 = arith.constant 8 : index
    %9 = vector.load %arg5[%c0_15, %c0_16, %c8] : memref<16x16x128xf32, #tpu.memory_space<vmem>>, vector<16x16x8xf32>
    tpu.vector_store %arg5[%c0_15, %c0_16, %c8], %8 {strides = array<i32>} : memref<16x16x128xf32, #tpu.memory_space<vmem>>, vector<16x16x8xf32>,
    %c0_17 = arith.constant 0 : index
    %c0_18 = arith.constant 0 : index
    %c2 = arith.constant 2 : index
    %c0_19 = arith.constant 0 : index
    %10 = vector.load %arg1[%c0_17, %c0_18, %c2, %c0_19] : memref<1x18x18x8xf32, #tpu.memory_space<vmem>>, vector<1x16x16x8xf32>
    %11 = vector.shape_cast %10 : vector<1x16x16x8xf32> to vector<16x16x8xf32>
    %c0_20 = arith.constant 0 : index
    %c0_21 = arith.constant 0 : index
    %c16 = arith.constant 16 : index
    %12 = vector.load %arg5[%c0_20, %c0_21, %c16] : memref<16x16x128xf32, #tpu.memory_space<vmem>>, vector<16x16x8xf32>
    tpu.vector_store %arg5[%c0_20, %c0_21, %c16], %11 {strides = array<i32>} : memref<16x16x128xf32, #tpu.memory_space<vmem>>, vector<16x16x8xf32>,
    %c0_22 = arith.constant 0 : index
    %c1_23 = arith.constant 1 : index
    %c0_24 = arith.constant 0 : index
    %c0_25 = arith.constant 0 : index
    %13 = vector.load %arg1[%c0_22, %c1_23, %c0_24, %c0_25] : memref<1x18x18x8xf32, #tpu.memory_space<vmem>>, vector<1x16x16x8xf32>
    %14 = vector.shape_cast %13 : vector<1x16x16x8xf32> to vector<16x16x8xf32>
    %c0_26 = arith.constant 0 : index
    %c0_27 = arith.constant 0 : index
    %c24 = arith.constant 24 : index
    %15 = vector.load %arg5[%c0_26, %c0_27, %c24] : memref<16x16x128xf32, #tpu.memory_space<vmem>>, vector<16x16x8xf32>
    tpu.vector_store %arg5[%c0_26, %c0_27, %c24], %14 {strides = array<i32>} : memref<16x16x128xf32, #tpu.memory_space<vmem>>, vector<16x16x8xf32>,
    %c0_28 = arith.constant 0 : index
    %c1_29 = arith.constant 1 : index
    %c1_30 = arith.constant 1 : index
    %c0_31 = arith.constant 0 : index
    %16 = vector.load %arg1[%c0_28, %c1_29, %c1_30, %c0_31] : memref<1x18x18x8xf32, #tpu.memory_space<vmem>>, vector<1x16x16x8xf32>
    %17 = vector.shape_cast %16 : vector<1x16x16x8xf32> to vector<16x16x8xf32>
    %c0_32 = arith.constant 0 : index
    %c0_33 = arith.constant 0 : index
    %c32 = arith.constant 32 : index
    %18 = vector.load %arg5[%c0_32, %c0_33, %c32] : memref<16x16x128xf32, #tpu.memory_space<vmem>>, vector<16x16x8xf32>
    tpu.vector_store %arg5[%c0_32, %c0_33, %c32], %17 {strides = array<i32>} : memref<16x16x128xf32, #tpu.memory_space<vmem>>, vector<16x16x8xf32>,
    %c0_34 = arith.constant 0 : index
    %c1_35 = arith.constant 1 : index
    %c2_36 = arith.constant 2 : index
    %c0_37 = arith.constant 0 : index
    %19 = vector.load %arg1[%c0_34, %c1_35, %c2_36, %c0_37] : memref<1x18x18x8xf32, #tpu.memory_space<vmem>>, vector<1x16x16x8xf32>
    %20 = vector.shape_cast %19 : vector<1x16x16x8xf32> to vector<16x16x8xf32>
    %c0_38 = arith.constant 0 : index
    %c0_39 = arith.constant 0 : index
    %c40 = arith.constant 40 : index
    %21 = vector.load %arg5[%c0_38, %c0_39, %c40] : memref<16x16x128xf32, #tpu.memory_space<vmem>>, vector<16x16x8xf32>
    tpu.vector_store %arg5[%c0_38, %c0_39, %c40], %20 {strides = array<i32>} : memref<16x16x128xf32, #tpu.memory_space<vmem>>, vector<16x16x8xf32>,
    %c0_40 = arith.constant 0 : index
    %c2_41 = arith.constant 2 : index
    %c0_42 = arith.constant 0 : index
    %c0_43 = arith.constant 0 : index
    %22 = vector.load %arg1[%c0_40, %c2_41, %c0_42, %c0_43] : memref<1x18x18x8xf32, #tpu.memory_space<vmem>>, vector<1x16x16x8xf32>
    %23 = vector.shape_cast %22 : vector<1x16x16x8xf32> to vector<16x16x8xf32>
    %c0_44 = arith.constant 0 : index
    %c0_45 = arith.constant 0 : index
    %c48 = arith.constant 48 : index
    %24 = vector.load %arg5[%c0_44, %c0_45, %c48] : memref<16x16x128xf32, #tpu.memory_space<vmem>>, vector<16x16x8xf32>
    tpu.vector_store %arg5[%c0_44, %c0_45, %c48], %23 {strides = array<i32>} : memref<16x16x128xf32, #tpu.memory_space<vmem>>, vector<16x16x8xf32>,
    %c0_46 = arith.constant 0 : index
    %c2_47 = arith.constant 2 : index
    %c1_48 = arith.constant 1 : index
    %c0_49 = arith.constant 0 : index
    %25 = vector.load %arg1[%c0_46, %c2_47, %c1_48, %c0_49] : memref<1x18x18x8xf32, #tpu.memory_space<vmem>>, vector<1x16x16x8xf32>
    %26 = vector.shape_cast %25 : vector<1x16x16x8xf32> to vector<16x16x8xf32>
    %c0_50 = arith.constant 0 : index
    %c0_51 = arith.constant 0 : index
    %c56 = arith.constant 56 : index
    %27 = vector.load %arg5[%c0_50, %c0_51, %c56] : memref<16x16x128xf32, #tpu.memory_space<vmem>>, vector<16x16x8xf32>
    tpu.vector_store %arg5[%c0_50, %c0_51, %c56], %26 {strides = array<i32>} : memref<16x16x128xf32, #tpu.memory_space<vmem>>, vector<16x16x8xf32>,
    %c0_52 = arith.constant 0 : index
    %c2_53 = arith.constant 2 : index
    %c2_54 = arith.constant 2 : index
    %c0_55 = arith.constant 0 : index
    %28 = vector.load %arg1[%c0_52, %c2_53, %c2_54, %c0_55] : memref<1x18x18x8xf32, #tpu.memory_space<vmem>>, vector<1x16x16x8xf32>
    %29 = vector.shape_cast %28 : vector<1x16x16x8xf32> to vector<16x16x8xf32>
    %c0_56 = arith.constant 0 : index
    %c0_57 = arith.constant 0 : index
    %c64 = arith.constant 64 : index
    %30 = vector.load %arg5[%c0_56, %c0_57, %c64] : memref<16x16x128xf32, #tpu.memory_space<vmem>>, vector<16x16x8xf32>
    tpu.vector_store %arg5[%c0_56, %c0_57, %c64], %29 {strides = array<i32>} : memref<16x16x128xf32, #tpu.memory_space<vmem>>, vector<16x16x8xf32>,
    %c0_58 = arith.constant 0 : index
    %c0_59 = arith.constant 0 : index
    %c0_60 = arith.constant 0 : index
    %31 = vector.load %arg5[%c0_58, %c0_59, %c0_60] : memref<16x16x128xf32, #tpu.memory_space<vmem>>, vector<16x16x128xf32>
    %32 = vector.shape_cast %31 : vector<16x16x128xf32> to vector<256x128xf32>
    %cst_61 = arith.constant dense<0.000000e+00> : vector<256x128xf32>
    %33 = tpu.matmul %32, %2, %cst_61 {dimension_numbers = #tpu.dot_dimension_numbers<[1], [0], [0], [1], [0, 0, 1, 1], [], []>} : vector<256x128xf32>, vector<128x128xf32>, vector<256x128xf32> -> vector<256x128xf32>
    %34 = vector.broadcast %3 : vector<1x128xf32> to vector<256x128xf32>
    %35 = arith.addf %33, %34 : vector<256x128xf32>
    %cst_62 = arith.constant 0.000000e+00 : f32
    %36 = vector.broadcast %cst_62 : f32 to vector<256x128xf32>
    %37 = arith.maximumf %35, %36 : vector<256x128xf32>
    %38 = vector.shape_cast %37 : vector<256x128xf32> to vector<16x16x128xf32>
    %c0_63 = arith.constant 0 : index
    %c0_64 = arith.constant 0 : index
    %c0_65 = arith.constant 0 : index
    %c0_66 = arith.constant 0 : index
    %39 = vector.load %arg4[%c0_63, %c0_64, %c0_65, %c0_66] : memref<1x16x16x128xf32, #tpu.memory_space<vmem>>, vector<1x16x16x128xf32>
    %40 = vector.shape_cast %39 : vector<1x16x16x128xf32> to vector<16x16x128xf32>
    %41 = vector.shape_cast %38 : vector<16x16x128xf32> to vector<1x16x16x128xf32>
    tpu.vector_store %arg4[%c0_63, %c0_64, %c0_65, %c0_66], %41 {strides = array<i32>} : memref<1x16x16x128xf32, #tpu.memory_space<vmem>>, vector<1x16x16x128xf32>,
    return
  }
  func.func @transform_0(%arg0: i32) -> (i32, i32, i32, i32) {
    %c0_i32 = arith.constant 0 : i32
    %c0_i32_0 = arith.constant 0 : i32
    %c0_i32_1 = arith.constant 0 : i32
    %c0_i32_2 = arith.constant 0 : i32
    return %arg0, %c0_i32, %c0_i32_0, %c0_i32_1 : i32, i32, i32, i32
  }
  func.func @transform_1(%arg0: i32) -> (i32, i32) {
    %c0_i32 = arith.constant 0 : i32
    %c0_i32_0 = arith.constant 0 : i32
    %c0_i32_1 = arith.constant 0 : i32
    return %c0_i32, %c0_i32_0 : i32, i32
  }
  func.func @transform_2(%arg0: i32) -> (i32, i32) {
    %c0_i32 = arith.constant 0 : i32
    %c0_i32_0 = arith.constant 0 : i32
    %c0_i32_1 = arith.constant 0 : i32
    return %c0_i32, %c0_i32_0 : i32, i32
  }
  func.func @transform_3(%arg0: i32) -> (i32, i32, i32, i32) {
    %c0_i32 = arith.constant 0 : i32
    %c0_i32_0 = arith.constant 0 : i32
    %c0_i32_1 = arith.constant 0 : i32
    %c0_i32_2 = arith.constant 0 : i32
    return %arg0, %c0_i32, %c0_i32_0, %c0_i32_1 : i32, i32, i32, i32
  }
}

</mosaic_0001>

<bundles_post_ra>
// kernel: common_conv_forward.1
= control target key start
LH: loop header
LB: loop body
LE: loop exit
PB: predicated region body
PF: predicated region fallthrough
CT: control target
= control target key end

     0   :  { %s2406_s12 = smov 0   ;;  %s3726_s0 = inlined_call_operand.vmem [shape: f32[2,18,18,8], index: 0, kind: input, shape index: {}]   ;;  %s3727_s1 = inlined_call_operand.vmem [shape: f32[128,128], index: 1, kind: input, shape index: {}]   ;;  %s3728_s2 = inlined_call_operand.vmem [shape: f32[1,128], index: 2, kind: input, shape index: {}]   ;;  %s3729_s3 = inlined_call_operand.vmem [shape: f32[2,16,16,128], index: 3, kind: output, shape index: {}]  }
   0x1 LB: > { %s2099_s13 = sadd.s32 4294967295, %s2375_s12   ;;  %p2103_p0 = scmp.ge.s32.totalorder %s2375_s12, 1  ;;  %s2375_s12 = sphi %s2406_s12, %s13_s12  }
   0x2   : > { %p137_p1 = scmp.lt.s32.totalorder %s2375_s12, 3 }
   0x4   : > { %p138_p2 = pnand %p2103_p0, %p137_p1 }
   0x6   : > { %141 = sbr.rel (%p138_p2) target bundleno = 953 (0x3b9), region = 32 }
   0xb   : > { %p161_p3 = scmp.lt.s32.totalorder %s2099_s13, 1  ;;  %s2377_s18 = smov 8   ;;  %vm171_vm0 = vcmask 1048128   ;;  %vm253_vm1 = vcmask 64512   ;;  %v2378_v33 = vmov 0.0   ;;  %vm446_vm2 = vcmask 130112  }
   0xc   : > { %172 = vst.msk [vmem:[#allocation2] sm:$0xff] %vm171_vm0, %v2378_v33  ;;  %s2379_s19 = smov 16   ;;  %s2380_s20 = smov 24   ;;  %vm639_vm3 = vcmask 195712   ;;  %vm833_vm4 = vcmask 261312   ;;  %vm1026_vm5 = vcmask 326912  }
   0xd   : > { %s3821_s13 = smov (!%p161_p3, %s2099_s13), 1  ;;  %173 = vst.msk [vmem:[#allocation2 + $0x8] sm:$0xff] %vm171_vm0, %v2378_v33  ;;  %s2381_s21 = smov 32   ;;  %vm1219_vm6 = vcmask 392512   ;;  %vm1413_vm7 = vcmask 458112   ;;  %vm1606_vm8 = vcmask 523712  }
   0xe   : > { %s2350_s14 = smul.u32 432, %s3821_s13  ;;  %174 = vst.msk [vmem:[#allocation2 + $0x10] sm:$0xff] %vm171_vm0, %v2378_v33  ;;  %s2382_s22 = smov 40   ;;  %vm1799_vm9 = vcmask 589312  }
   0xf   : > { %175 = vst.msk [vmem:[#allocation2 + $0x18] sm:$0xff] %vm171_vm0, %v2378_v33  ;;  %s2383_s23 = smov 48   ;;  %s2384_s24 = smov 56  }
  0x10   : > { %s2420_s17 = scalar_lea.vmem %s3726_s0, %s2350_s14  ;;  %176 = vst.msk [vmem:[#allocation2 + $0x20] sm:$0xff] %vm171_vm0, %v2378_v33  ;;  %s2385_s25 = smov 64  }
  0x11   : > { %v286_v0 = vld [vmem:[%s2420_s17 + $0x1] sm:$0xff]  ;;  %v2424_v1 = vld [vmem:[%s2420_s17 + $0x19] sm:$0xff]  ;;  %v2430_v2 = vld [vmem:[%s2420_s17 + $0x31] sm:$0xff]  ;;  %177 = vst.msk [vmem:[#allocation2 + $0x28] sm:$0xff] %vm171_vm0, %v2378_v33 }
  0x12   : > { %350 = vrot.lane.b32.xlu0 %v286_v0, %s2377_s18  ;;  %354 = vrot.lane.b32.xlu1 %v2424_v1, %s2377_s18  ;;  %v287_v3 = vld [vmem:[%s2420_s17 + $0x9] sm:$0xff]  ;;  %v2436_v4 = vld [vmem:[%s2420_s17 + $0x21] sm:$0xff]  ;;  %178 = vst.msk [vmem:[#allocation2 + $0x30] sm:$0xff] %vm171_vm0, %v2378_v33 }
  0x13   : > { %358 = vrot.lane.b32.xlu2 %v2430_v2, %s2377_s18  ;;  %v2442_v5 = vld [vmem:[%s2420_s17 + $0x39] sm:$0xff]  ;;  %v2447_v6 = vld [vmem:[%s2420_s17 + $0x49] sm:$0xff]  ;;  %v2450_v7 = vld [vmem:[%s2420_s17 + $0x51] sm:$0xff]  ;;  %179 = vst.msk [vmem:[#allocation2 + $0x38] sm:$0xff] %vm171_vm0, %v2378_v33 }
  0x14   : > { %v2457_v8 = vld [vmem:[%s2420_s17 + $0x61] sm:$0xff]  ;;  %v2462_v9 = vld [vmem:[%s2420_s17 + $0x69] sm:$0xff]  ;;  %v2465_v10 = vld [vmem:[%s2420_s17 + $0x79] sm:$0xff]  ;;  %180 = vst.msk [vmem:[#allocation2 + $0x40] sm:$0xff] %vm171_vm0, %v2378_v33 }
  0x15   : > { %v2472_v11 = vld [vmem:[%s2420_s17 + $0x81] sm:$0xff]  ;;  %v2477_v12 = vld [vmem:[%s2420_s17 + $0x91] sm:$0xff]  ;;  %v2480_v13 = vld [vmem:[%s2420_s17 + $0x99] sm:$0xff]  ;;  %181 = vst.msk [vmem:[#allocation2 + $0x48] sm:$0xff] %vm171_vm0, %v2378_v33 }
  0x16   : > { %v2487_v14 = vld [vmem:[%s2420_s17 + $0xa9] sm:$0xff]  ;;  %v2492_v15 = vld [vmem:[%s2420_s17 + $0xb1] sm:$0xff]  ;;  %v2495_v16 = vld [vmem:[%s2420_s17 + $0xc1] sm:$0xff]  ;;  %182 = vst.msk [vmem:[#allocation2 + $0x50] sm:$0xff] %vm171_vm0, %v2378_v33 }
  0x17   : > { %v2502_v17 = vld [vmem:[%s2420_s17 + $0xc9] sm:$0xff]  ;;  %v2507_v18 = vld [vmem:[%s2420_s17 + $0xd9] sm:$0xff]  ;;  %v2510_v19 = vld [vmem:[%s2420_s17 + $0xe1] sm:$0xff]  ;;  %183 = vst.msk [vmem:[#allocation2 + $0x58] sm:$0xff] %vm171_vm0, %v2378_v33 }
  0x18   : > { %v2517_v20 = vld [vmem:[%s2420_s17 + $0xf1] sm:$0xff]  ;;  %v2522_v21 = vld [vmem:[%s2420_s17 + $0xf9] sm:$0xff]  ;;  %v2525_v22 = vld [vmem:[%s2420_s17 + $0x109] sm:$0xff]  ;;  %184 = vst.msk [vmem:[#allocation2 + $0x60] sm:$0xff] %vm171_vm0, %v2378_v33 }
  0x19   : > { %v2532_v23 = vld [vmem:[%s2420_s17 + $0x111] sm:$0xff]  ;;  %v2537_v24 = vld [vmem:[%s2420_s17 + $0x121] sm:$0xff]  ;;  %v2540_v25 = vld [vmem:[%s2420_s17 + $0x129] sm:$0xff]  ;;  %185 = vst.msk [vmem:[#allocation2 + $0x68] sm:$0xff] %vm171_vm0, %v2378_v33 }
  0x1a   : > { %352 = vrot.lane.b32.xlu0 %v287_v3, %s2377_s18  ;;  %356 = vrot.lane.b32.xlu1 %v2436_v4, %s2377_s18  ;;  %v2547_v26 = vld [vmem:[%s2420_s17 + $0x139] sm:$0xff]  ;;  %v2552_v27 = vld [vmem:[%s2420_s17 + $0x141] sm:$0xff]  ;;  %186 = vst.msk [vmem:[#allocation2 + $0x70] sm:$0xff] %vm171_vm0, %v2378_v33 }
  0x1b   : > { %360 = vrot.lane.b32.xlu2 %v2442_v5, %s2377_s18  ;;  %v2555_v28 = vld [vmem:[%s2420_s17 + $0x151] sm:$0xff]  ;;  %v2562_v29 = vld [vmem:[%s2420_s17 + $0x159] sm:$0xff]  ;;  %v2567_v30 = vld [vmem:[%s2420_s17 + $0x169] sm:$0xff]  ;;  %187 = vst.msk [vmem:[#allocation2 + $0x78] sm:$0xff] %vm171_vm0, %v2378_v33 }
  0x1c   : > { %v2570_v31 = vld [vmem:[%s2420_s17 + $0x171] sm:$0xff]  ;;  %v479_v32 = vld [vmem:[%s2420_s17 + $0x2] sm:$0xff]  ;;  %v2588_v36 = vld [vmem:[%s2420_s17 + $0x1a] sm:$0xff]  ;;  %188 = vst.msk [vmem:[#allocation2 + $0x80] sm:$0xff] %vm171_vm0, %v2378_v33 }
  0x1d   : > { %v221_v34 = vld [vmem:[%s2420_s17] sm:$0xff]  ;;  %v480_v35 = vld [vmem:[%s2420_s17 + $0xa] sm:$0xff]  ;;  %3760 = vst [vmem:[#allocation3_spill] sm:$0xff] %v2588_v36  ;;  %v2615_v38 = vld [vmem:[%s2420_s17 + $0x32] sm:$0xff] }
  0x1e   : > { %254 = vst.msk [vmem:[#allocation2] sm:$0xff] %vm253_vm1, %v221_v34  ;;  %v2602_v37 = vld [vmem:[%s2420_s17 + $0x22] sm:$0xff]  ;;  %v2618_v39 = vld [vmem:[%s2420_s17 + $0x3a] sm:$0xff]  ;;  %v2633_v41 = vld [vmem:[%s2420_s17 + $0x4a] sm:$0xff] }
  0x1f   : > { %3761 = vst [vmem:[#allocation4_spill] sm:$0xff] %v2602_v37  ;;  %v2646_v42 = vld [vmem:[%s2420_s17 + $0x52] sm:$0xff]  ;;  %v2649_v43 = vld [vmem:[%s2420_s17 + $0x62] sm:$0xff]  ;;  %v2664_v45 = vld [vmem:[%s2420_s17 + $0x6a] sm:$0xff] }
  0x20   : > { %3762 = vst [vmem:[#allocation5_spill] sm:$0xff] %v2615_v38  ;;  %v2677_v46 = vld [vmem:[%s2420_s17 + $0x7a] sm:$0xff]  ;;  %v2682_v47 = vld [vmem:[%s2420_s17 + $0x82] sm:$0xff]  ;;  %v2698_v50 = vld [vmem:[%s2420_s17 + $0x92] sm:$0xff] }
  0x21   : > { %3763 = vst [vmem:[#allocation6_spill] sm:$0xff] %v2618_v39  ;;  %v2689_v49 = vld [vmem:[%s2420_s17 + $0x18] sm:$0xff]  ;;  %v2705_v53 = vld [vmem:[%s2420_s17 + $0x30] sm:$0xff]  ;;  %v222_v54 = vld [vmem:[%s2420_s17 + $0x8] sm:$0xff] }
  0x22   : > { %362 = vrot.lane.b32.xlu0 %v2447_v6, %s2377_s18  ;;  %364 = vrot.lane.b32.xlu1 %v2450_v7, %s2377_s18  ;;  %3764 = vst [vmem:[#allocation7_spill] sm:$0xff] %v2633_v41  ;;  %v2713_v55 = vld [vmem:[%s2420_s17 + $0x9a] sm:$0xff]  ;;  %v2718_v56 = vld [vmem:[%s2420_s17 + $0xaa] sm:$0xff] }
  0x23   : > { %366 = vrot.lane.b32.xlu2 %v2457_v8, %s2377_s18  ;;  %189 = vst.msk [vmem:[#allocation2 + $0x88] sm:$0xff] %vm171_vm0, %v2378_v33  ;;  %v2721_v57 = vld [vmem:[%s2420_s17 + $0x20] sm:$0xff]  ;;  %v2725_v59 = vld [vmem:[%s2420_s17 + $0x38] sm:$0xff]  ;;  %v2741_v63 = vld [vmem:[%s2420_s17 + $0x48] sm:$0xff] }
  0x24   : > { %190 = vst.msk [vmem:[#allocation2 + $0x90] sm:$0xff] %vm171_vm0, %v2378_v33  ;;  %v2735_v60 = vld [vmem:[%s2420_s17 + $0xb2] sm:$0xff]  ;;  %v2751_v3 = vld [vmem:[%s2420_s17 + $0x60] sm:$0xff] }
  0x25   : > { %3765 = vst [vmem:[#allocation8_spill] sm:$0xff] %v2646_v42  ;;  %v2745_v0 = vld [vmem:[%s2420_s17 + $0x50] sm:$0xff] }
  0x26   : > { %3766 = vst [vmem:[#allocation9_spill] sm:$0xff] %v2649_v43 }
  0x27   : > { %191 = vst.msk [vmem:[#allocation2 + $0x98] sm:$0xff] %vm171_vm0, %v2378_v33 }
  0x28   : > { %192 = vst.msk [vmem:[#allocation2 + $0xa0] sm:$0xff] %vm171_vm0, %v2378_v33 }
  0x29   : > { %193 = vst.msk [vmem:[#allocation2 + $0xa8] sm:$0xff] %vm171_vm0, %v2378_v33 }
  0x2a   : > { %368 = vrot.lane.b32.xlu0 %v2462_v9, %s2377_s18  ;;  %370 = vrot.lane.b32.xlu1 %v2465_v10, %s2377_s18  ;;  %194 = vst.msk [vmem:[#allocation2 + $0xb0] sm:$0xff] %vm171_vm0, %v2378_v33 }
  0x2b   : > { %372 = vrot.lane.b32.xlu2 %v2472_v11, %s2377_s18  ;;  %3767 = vst [vmem:[#allocation10_spill] sm:$0xff] %v2664_v45 }
  0x2c   : > { %195 = vst.msk [vmem:[#allocation2 + $0xb8] sm:$0xff] %vm171_vm0, %v2378_v33 }
  0x2d   : > { %196 = vst.msk [vmem:[#allocation2 + $0xc0] sm:$0xff] %vm171_vm0, %v2378_v33 }
  0x2e   : > { %197 = vst.msk [vmem:[#allocation2 + $0xc8] sm:$0xff] %vm171_vm0, %v2378_v33 }
  0x2f   : > { %198 = vst.msk [vmem:[#allocation2 + $0xd0] sm:$0xff] %vm171_vm0, %v2378_v33 }
  0x30   : > { %3768 = vst [vmem:[#allocation11_spill] sm:$0xff] %v2677_v46 }
  0x31   : > { %199 = vst.msk [vmem:[#allocation2 + $0xd8] sm:$0xff] %vm171_vm0, %v2378_v33 }
  0x32   : > { %374 = vrot.lane.b32.xlu0 %v2477_v12, %s2377_s18  ;;  %376 = vrot.lane.b32.xlu1 %v2480_v13, %s2377_s18  ;;  %3769 = vst [vmem:[#allocation12_spill] sm:$0xff] %v2682_v47 }
  0x33   : > { %378 = vrot.lane.b32.xlu2 %v2487_v14, %s2377_s18  ;;  %200 = vst.msk [vmem:[#allocation2 + $0xe0] sm:$0xff] %vm171_vm0, %v2378_v33 }
  0x34   : > { %201 = vst.msk [vmem:[#allocation2 + $0xe8] sm:$0xff] %vm171_vm0, %v2378_v33 }
  0x35   : > { %202 = vst.msk [vmem:[#allocation2 + $0xf0] sm:$0xff] %vm171_vm0, %v2378_v33 }
  0x36   : > { %3770 = vst [vmem:[#allocation13_spill] sm:$0xff] %v2698_v50 }
  0x37   : > { %203 = vst.msk [vmem:[#allocation2 + $0xf8] sm:$0xff] %vm171_vm0, %v2378_v33  ;;  %v2759_v33 = vld [vmem:[%s2420_s17 + $0xca] sm:$0xff] }
  0x38   : > { %256 = vst.msk [vmem:[#allocation2 + $0x10] sm:$0xff] %vm253_vm1, %v2689_v49 }
  0x39   : > { %3771 = vst [vmem:[#allocation14_spill] sm:$0xff] %v2713_v55 }
  0x3a   : > { %380 = vrot.lane.b32.xlu0 %v2492_v15, %s2377_s18  ;;  %382 = vrot.lane.b32.xlu1 %v2495_v16, %s2377_s18  ;;  %258 = vst.msk [vmem:[#allocation2 + $0x20] sm:$0xff] %vm253_vm1, %v2705_v53 }
  0x3b   : > { %384 = vrot.lane.b32.xlu2 %v2502_v17, %s2377_s18  ;;  %3772 = vst [vmem:[#allocation15_spill] sm:$0xff] %v2718_v56 }
  0x3c   : > { %255 = vst.msk [vmem:[#allocation2 + $0x8] sm:$0xff] %vm253_vm1, %v222_v54  ;;  %v2784_v54 = vld [vmem:[%s2420_s17 + $0x80] sm:$0xff] }
  0x3d   : > { %257 = vst.msk [vmem:[#allocation2 + $0x18] sm:$0xff] %vm253_vm1, %v2721_v57 }
  0x3e   : > { %3773 = vst [vmem:[#allocation16_spill] sm:$0xff] %v2735_v60 }
  0x3f   : > { %259 = vst.msk [vmem:[#allocation2 + $0x28] sm:$0xff] %vm253_vm1, %v2725_v59 }
  0x40   : > { %260 = vst.msk [vmem:[#allocation2 + $0x30] sm:$0xff] %vm253_vm1, %v2741_v63 }
  0x41   : > { %3775 = vst [vmem:[#allocation18_spill] sm:$0xff] %v2759_v33 }
  0x42   : > { %386 = vrot.lane.b32.xlu0 %v2507_v18, %s2377_s18  ;;  %388 = vrot.lane.b32.xlu1 %v2510_v19, %s2377_s18  ;;  %261 = vst.msk [vmem:[#allocation2 + $0x38] sm:$0xff] %vm253_vm1, %v2745_v0 }
  0x43   : > { %390 = vrot.lane.b32.xlu2 %v2517_v20, %s2377_s18  ;;  %262 = vst.msk [vmem:[#allocation2 + $0x40] sm:$0xff] %vm253_vm1, %v2751_v3 }
  0x44   : > { %265 = vst.msk [vmem:[#allocation2 + $0x58] sm:$0xff] %vm253_vm1, %v2784_v54 }
  0x4a   : > { %392 = vrot.lane.b32.xlu0 %v2522_v21, %s2377_s18  ;;  %394 = vrot.lane.b32.xlu1 %v2525_v22, %s2377_s18 }
  0x4b   : > { %396 = vrot.lane.b32.xlu2 %v2532_v23, %s2377_s18 }
  0x52   : > { %398 = vrot.lane.b32.xlu0 %v2537_v24, %s2377_s18  ;;  %400 = vrot.lane.b32.xlu1 %v2540_v25, %s2377_s18 }
  0x53   : > { %402 = vrot.lane.b32.xlu2 %v2547_v26, %s2377_s18 }
  0x5a   : > { %404 = vrot.lane.b32.xlu0 %v2552_v27, %s2377_s18  ;;  %406 = vrot.lane.b32.xlu1 %v2555_v28, %s2377_s18 }
  0x5b   : > { %408 = vrot.lane.b32.xlu2 %v2562_v29, %s2377_s18 }
  0x62   : > { %410 = vrot.lane.b32.xlu0 %v2567_v30, %s2377_s18  ;;  %412 = vrot.lane.b32.xlu1 %v2570_v31, %s2377_s18 }
  0x63   : > { %543 = vrot.lane.b32.xlu2 %v479_v32, %s2379_s19  ;;  %v2754_v32 = vld [vmem:[%s2420_s17 + $0xc2] sm:$0xff] }
  0x64   : > { %3774 = vst [vmem:[#allocation17_spill] sm:$0xff] %v2754_v32 }
  0x6a   : > { %545 = vrot.lane.b32.xlu0 %v480_v35, %s2379_s19  ;;  %547 = vrot.lane.b32.xlu1 %v2588_v36, %s2379_s19  ;;  %v2764_v35 = vld [vmem:[%s2420_s17 + $0x68] sm:$0xff]  ;;  %v2948_v36 = vld [vmem:[%s2420_s17 + $0x158] sm:$0xff] }
  0x6b   : > { %549 = vrot.lane.b32.xlu2 %v2602_v37, %s2379_s19  ;;  %263 = vst.msk [vmem:[#allocation2 + $0x48] sm:$0xff] %vm253_vm1, %v2764_v35 }
  0x6c   : > { %283 = vst.msk [vmem:[#allocation2 + $0xe8] sm:$0xff] %vm253_vm1, %v2948_v36 }
  0x6d   : > { %v359_v40 = vpop.permute.xlu2 %358 }
  0x6e   : > { %451 = vst.msk [vmem:[#allocation2 + $0x20] sm:$0xff] %vm446_vm2, %v359_v40  ;;  %v2769_v40 = vld [vmem:[%s2420_s17 + $0x78] sm:$0xff] }
  0x6f   : > { %264 = vst.msk [vmem:[#allocation2 + $0x50] sm:$0xff] %vm253_vm1, %v2769_v40 }
  0x72   : > { %551 = vrot.lane.b32.xlu0 %v2615_v38, %s2379_s19  ;;  %553 = vrot.lane.b32.xlu1 %v2618_v39, %s2379_s19  ;;  %v2921_v39 = vld [vmem:[%s2420_s17 + $0x15a] sm:$0xff] }
  0x73   : > { %555 = vrot.lane.b32.xlu2 %v2633_v41, %s2379_s19  ;;  %v2918_v41 = vld [vmem:[%s2420_s17 + $0x152] sm:$0xff]  ;;  %3787 = vst [vmem:[#allocation30_spill] sm:$0xff] %v2921_v39 }
  0x74   : > { %3786 = vst [vmem:[#allocation29_spill] sm:$0xff] %v2918_v41 }
  0x75   : > { %v361_v44 = vpop.permute.xlu2 %360 }
  0x76   : > { %452 = vst.msk [vmem:[#allocation2 + $0x28] sm:$0xff] %vm446_vm2, %v361_v44  ;;  %v2777_v44 = vld [vmem:[%s2420_s17 + $0xda] sm:$0xff] }
  0x77   : > { %3776 = vst [vmem:[#allocation19_spill] sm:$0xff] %v2777_v44 }
  0x7a   : > { %557 = vrot.lane.b32.xlu0 %v2646_v42, %s2379_s19  ;;  %559 = vrot.lane.b32.xlu1 %v2649_v43, %s2379_s19  ;;  %v2905_v42 = vld [vmem:[%s2420_s17 + $0x120] sm:$0xff] }
  0x7b   : > { %561 = vrot.lane.b32.xlu2 %v2664_v45, %s2379_s19  ;;  %v2884_v45 = vld [vmem:[%s2420_s17 + $0x108] sm:$0xff]  ;;  %278 = vst.msk [vmem:[#allocation2 + $0xc0] sm:$0xff] %vm253_vm1, %v2905_v42 }
  0x7c   : > { %276 = vst.msk [vmem:[#allocation2 + $0xb0] sm:$0xff] %vm253_vm1, %v2884_v45 }
  0x7d   : > { %v367_v48 = vpop.permute.xlu2 %366 }
  0x7e   : > { %455 = vst.msk [vmem:[#allocation2 + $0x40] sm:$0xff] %vm446_vm2, %v367_v48  ;;  %v2791_v48 = vld [vmem:[%s2420_s17 + $0x90] sm:$0xff] }
  0x7f   : > { %266 = vst.msk [vmem:[#allocation2 + $0x60] sm:$0xff] %vm253_vm1, %v2791_v48 }
  0x82   : > { %563 = vrot.lane.b32.xlu0 %v2677_v46, %s2379_s19  ;;  %565 = vrot.lane.b32.xlu1 %v2682_v47, %s2379_s19  ;;  %v2866_v46 = vld [vmem:[%s2420_s17 + $0xf0] sm:$0xff] }
  0x83   : > { %567 = vrot.lane.b32.xlu2 %v2698_v50, %s2379_s19  ;;  %274 = vst.msk [vmem:[#allocation2 + $0xa0] sm:$0xff] %vm253_vm1, %v2866_v46 }
  0x84   : > { %v351_v51 = vpop.permute.xlu0 %350  ;;  %v355_v52 = vpop.permute.xlu1 %354 }
  0x85   : > { %447 = vst.msk [vmem:[#allocation2] sm:$0xff] %vm446_vm2, %v351_v51  ;;  %v373_v58 = vpop.permute.xlu2 %372 }
  0x86   : > { %449 = vst.msk [vmem:[#allocation2 + $0x10] sm:$0xff] %vm446_vm2, %v355_v52 }
  0x87   : > { %458 = vst.msk [vmem:[#allocation2 + $0x58] sm:$0xff] %vm446_vm2, %v373_v58 }
  0x8a   : > { %569 = vrot.lane.b32.xlu0 %v2713_v55, %s2379_s19  ;;  %571 = vrot.lane.b32.xlu1 %v2718_v56, %s2379_s19  ;;  %v2836_v56 = vld [vmem:[%s2420_s17 + $0x10a] sm:$0xff]  ;;  %v2839_v55 = vld [vmem:[%s2420_s17 + $0x112] sm:$0xff] }
  0x8b   : > { %573 = vrot.lane.b32.xlu2 %v2735_v60, %s2379_s19  ;;  %v2823_v60 = vld [vmem:[%s2420_s17 + $0xb0] sm:$0xff]  ;;  %3780 = vst [vmem:[#allocation23_spill] sm:$0xff] %v2836_v56 }
  0x8c   : > { %v353_v61 = vpop.permute.xlu0 %352  ;;  %v357_v62 = vpop.permute.xlu1 %356  ;;  %3781 = vst [vmem:[#allocation24_spill] sm:$0xff] %v2839_v55 }
  0x8d   : > { %448 = vst.msk [vmem:[#allocation2 + $0x8] sm:$0xff] %vm446_vm2, %v353_v61  ;;  %v379_v34 = vpop.permute.xlu2 %378  ;;  %v2794_v61 = vld [vmem:[%s2420_s17 + $0xe2] sm:$0xff] }
  0x8e   : > { %450 = vst.msk [vmem:[#allocation2 + $0x18] sm:$0xff] %vm446_vm2, %v357_v62  ;;  %v2797_v62 = vld [vmem:[%s2420_s17 + $0xf2] sm:$0xff] }
  0x8f   : > { %3777 = vst [vmem:[#allocation20_spill] sm:$0xff] %v2794_v61 }
  0x90   : > { %3778 = vst [vmem:[#allocation21_spill] sm:$0xff] %v2797_v62 }
  0x91   : > { %269 = vst.msk [vmem:[#allocation2 + $0x78] sm:$0xff] %vm253_vm1, %v2823_v60 }
  0x92   : > { %575 = vrot.lane.b32.xlu0 %v2754_v32, %s2379_s19  ;;  %577 = vrot.lane.b32.xlu1 %v2759_v33, %s2379_s19  ;;  %v2802_v33 = vld [vmem:[%s2420_s17 + $0x98] sm:$0xff] }
  0x93   : > { %579 = vrot.lane.b32.xlu2 %v2777_v44, %s2379_s19  ;;  %267 = vst.msk [vmem:[#allocation2 + $0x68] sm:$0xff] %vm253_vm1, %v2802_v33 }
  0x94   : > { %v363_v51 = vpop.permute.xlu0 %362  ;;  %v365_v52 = vpop.permute.xlu1 %364 }
  0x95   : > { %453 = vst.msk [vmem:[#allocation2 + $0x30] sm:$0xff] %vm446_vm2, %v363_v51  ;;  %v385_v32 = vpop.permute.xlu2 %384  ;;  %v2806_v51 = vld [vmem:[%s2420_s17 + $0xa8] sm:$0xff] }
  0x96   : > { %454 = vst.msk [vmem:[#allocation2 + $0x38] sm:$0xff] %vm446_vm2, %v365_v52  ;;  %v2817_v52 = vld [vmem:[%s2420_s17 + $0xfa] sm:$0xff] }
  0x97   : > { %3779 = vst [vmem:[#allocation22_spill] sm:$0xff] %v2817_v52 }
  0x98   : > { %268 = vst.msk [vmem:[#allocation2 + $0x70] sm:$0xff] %vm253_vm1, %v2806_v51 }
  0x99   : > { %461 = vst.msk [vmem:[#allocation2 + $0x70] sm:$0xff] %vm446_vm2, %v379_v34 }
  0x9a   : > { %581 = vrot.lane.b32.xlu0 %v2794_v61, %s2379_s19  ;;  %583 = vrot.lane.b32.xlu1 %v2797_v62, %s2379_s19  ;;  %v2827_v62 = vld [vmem:[%s2420_s17 + $0xc0] sm:$0xff]  ;;  %v2833_v61 = vld [vmem:[%s2420_s17 + $0xc8] sm:$0xff] }
  0x9b   : > { %585 = vrot.lane.b32.xlu2 %v2817_v52, %s2379_s19  ;;  %270 = vst.msk [vmem:[#allocation2 + $0x80] sm:$0xff] %vm253_vm1, %v2827_v62  ;;  %v2859_v52 = vld [vmem:[%s2420_s17 + $0x122] sm:$0xff] }
  0x9c   : > { %v369_v58 = vpop.permute.xlu0 %368  ;;  %v371_v44 = vpop.permute.xlu1 %370  ;;  %271 = vst.msk [vmem:[#allocation2 + $0x88] sm:$0xff] %vm253_vm1, %v2833_v61 }
  0x9d   : > { %456 = vst.msk [vmem:[#allocation2 + $0x48] sm:$0xff] %vm446_vm2, %v369_v58  ;;  %v391_v34 = vpop.permute.xlu2 %390  ;;  %v2846_v58 = vld [vmem:[%s2420_s17 + $0xd8] sm:$0xff] }
  0x9e   : > { %457 = vst.msk [vmem:[#allocation2 + $0x50] sm:$0xff] %vm446_vm2, %v371_v44  ;;  %v2851_v44 = vld [vmem:[%s2420_s17 + $0xe0] sm:$0xff] }
  0x9f   : > { %464 = vst.msk [vmem:[#allocation2 + $0x88] sm:$0xff] %vm446_vm2, %v385_v32  ;;  %v2873_v32 = vld [vmem:[%s2420_s17 + $0xf8] sm:$0xff] }
  0xa0   : > { %3782 = vst [vmem:[#allocation25_spill] sm:$0xff] %v2859_v52 }
  0xa1   : > { %272 = vst.msk [vmem:[#allocation2 + $0x90] sm:$0xff] %vm253_vm1, %v2846_v58 }
  0xa2   : > { %587 = vrot.lane.b32.xlu0 %v2836_v56, %s2379_s19  ;;  %589 = vrot.lane.b32.xlu1 %v2839_v55, %s2379_s19  ;;  %273 = vst.msk [vmem:[#allocation2 + $0x98] sm:$0xff] %vm253_vm1, %v2851_v44  ;;  %v2876_v55 = vld [vmem:[%s2420_s17 + $0x12a] sm:$0xff]  ;;  %v2879_v56 = vld [vmem:[%s2420_s17 + $0x13a] sm:$0xff] }
  0xa3   : > { %591 = vrot.lane.b32.xlu2 %v2859_v52, %s2379_s19  ;;  %3783 = vst [vmem:[#allocation26_spill] sm:$0xff] %v2876_v55 }
  0xa4   : > { %v375_v50 = vpop.permute.xlu0 %374  ;;  %v377_v47 = vpop.permute.xlu1 %376  ;;  %3784 = vst [vmem:[#allocation27_spill] sm:$0xff] %v2879_v56 }
  0xa5   : > { %459 = vst.msk [vmem:[#allocation2 + $0x60] sm:$0xff] %vm446_vm2, %v375_v50  ;;  %v397_v43 = vpop.permute.xlu2 %396  ;;  %v2888_v50 = vld [vmem:[%s2420_s17 + $0x110] sm:$0xff] }
  0xa6   : > { %460 = vst.msk [vmem:[#allocation2 + $0x68] sm:$0xff] %vm446_vm2, %v377_v47  ;;  %v2899_v47 = vld [vmem:[%s2420_s17 + $0x142] sm:$0xff] }
  0xa7   : > { %467 = vst.msk [vmem:[#allocation2 + $0xa0] sm:$0xff] %vm446_vm2, %v391_v34 }
  0xa8   : > { %275 = vst.msk [vmem:[#allocation2 + $0xa8] sm:$0xff] %vm253_vm1, %v2873_v32 }
  0xa9   : > { %3785 = vst [vmem:[#allocation28_spill] sm:$0xff] %v2899_v47 }
  0xaa   : > { %593 = vrot.lane.b32.xlu0 %v2876_v55, %s2379_s19  ;;  %595 = vrot.lane.b32.xlu1 %v2879_v56, %s2379_s19  ;;  %277 = vst.msk [vmem:[#allocation2 + $0xb8] sm:$0xff] %vm253_vm1, %v2888_v50  ;;  %v2911_v56 = vld [vmem:[%s2420_s17 + $0x128] sm:$0xff]  ;;  %v2915_v55 = vld [vmem:[%s2420_s17 + $0x138] sm:$0xff] }
  0xab   : > { %470 = vst.msk [vmem:[#allocation2 + $0xb8] sm:$0xff] %vm446_vm2, %v397_v43  ;;  %597 = vrot.lane.b32.xlu2 %v2899_v47, %s2379_s19  ;;  %v2941_v47 = vld [vmem:[%s2420_s17 + $0x150] sm:$0xff] }
  0xac   : > { %v381_v34 = vpop.permute.xlu0 %380  ;;  %v383_v52 = vpop.permute.xlu1 %382  ;;  %279 = vst.msk [vmem:[#allocation2 + $0xc8] sm:$0xff] %vm253_vm1, %v2911_v56 }
  0xad   : > { %462 = vst.msk [vmem:[#allocation2 + $0x78] sm:$0xff] %vm446_vm2, %v381_v34  ;;  %v403_v43 = vpop.permute.xlu2 %402  ;;  %v2928_v34 = vld [vmem:[%s2420_s17 + $0x140] sm:$0xff] }
  0xae   : > { %463 = vst.msk [vmem:[#allocation2 + $0x80] sm:$0xff] %vm446_vm2, %v383_v52  ;;  %v2938_v52 = vld [vmem:[%s2420_s17 + $0x16a] sm:$0xff] }
  0xaf   : > { %280 = vst.msk [vmem:[#allocation2 + $0xd0] sm:$0xff] %vm253_vm1, %v2915_v55 }
  0xb0   : > { %473 = vst.msk [vmem:[#allocation2 + $0xd0] sm:$0xff] %vm446_vm2, %v403_v43  ;;  %v2955_v43 = vld [vmem:[%s2420_s17 + $0x168] sm:$0xff] }
  0xb1   : > { %3788 = vst [vmem:[#allocation31_spill] sm:$0xff] %v2938_v52 }
  0xb2   : > { %599 = vrot.lane.b32.xlu0 %v2918_v41, %s2379_s19  ;;  %601 = vrot.lane.b32.xlu1 %v2921_v39, %s2379_s19  ;;  %281 = vst.msk [vmem:[#allocation2 + $0xd8] sm:$0xff] %vm253_vm1, %v2928_v34  ;;  %v2958_v39 = vld [vmem:[%s2420_s17 + $0x172] sm:$0xff] }
  0xb3   : > { %282 = vst.msk [vmem:[#allocation2 + $0xe0] sm:$0xff] %vm253_vm1, %v2941_v47  ;;  %603 = vrot.lane.b32.xlu2 %v2938_v52, %s2379_s19 }
  0xb4   : > { %v387_v38 = vpop.permute.xlu0 %386  ;;  %v389_v37 = vpop.permute.xlu1 %388  ;;  %3789 = vst [vmem:[#allocation32_spill] sm:$0xff] %v2958_v39 }
  0xb5   : > { %465 = vst.msk [vmem:[#allocation2 + $0x90] sm:$0xff] %vm446_vm2, %v387_v38  ;;  %v409_v41 = vpop.permute.xlu2 %408 }
  0xb6   : > { %466 = vst.msk [vmem:[#allocation2 + $0x98] sm:$0xff] %vm446_vm2, %v389_v37  ;;  %v2970_v37 = vld [vmem:[%s2420_s17 + $0x170] sm:$0xff] }
  0xb7   : > { %476 = vst.msk [vmem:[#allocation2 + $0xe8] sm:$0xff] %vm446_vm2, %v409_v41 }
  0xb8   : > { %284 = vst.msk [vmem:[#allocation2 + $0xf0] sm:$0xff] %vm253_vm1, %v2955_v43 }
  0xb9   : > { %285 = vst.msk [vmem:[#allocation2 + $0xf8] sm:$0xff] %vm253_vm1, %v2970_v37 }
  0xba   : > { %605 = vrot.lane.b32.xlu0 %v2958_v39, %s2379_s19  ;;  %737 = vrot.lane.b32.xlu1 %v2689_v49, %s2380_s20 }
  0xbb   : > { %739 = vrot.lane.b32.xlu2 %v2721_v57, %s2380_s20 }
  0xbc   : > { %v393_v38 = vpop.permute.xlu0 %392  ;;  %v395_v52 = vpop.permute.xlu1 %394 }
  0xbd   : > { %468 = vst.msk [vmem:[#allocation2 + $0xa8] sm:$0xff] %vm446_vm2, %v393_v38  ;;  %v544_v41 = vpop.permute.xlu2 %543 }
  0xbe   : > { %469 = vst.msk [vmem:[#allocation2 + $0xb0] sm:$0xff] %vm446_vm2, %v395_v52 }
  0xbf   : > { %640 = vst.msk [vmem:[#allocation2] sm:$0xff] %vm639_vm3, %v544_v41 }
  0xc2   : > { %741 = vrot.lane.b32.xlu0 %v2705_v53, %s2380_s20  ;;  %743 = vrot.lane.b32.xlu1 %v2725_v59, %s2380_s20 }
  0xc3   : > { %745 = vrot.lane.b32.xlu2 %v2741_v63, %s2380_s20 }
  0xc4   : > { %v399_v49 = vpop.permute.xlu0 %398  ;;  %v401_v39 = vpop.permute.xlu1 %400 }
  0xc5   : > { %471 = vst.msk [vmem:[#allocation2 + $0xc0] sm:$0xff] %vm446_vm2, %v399_v49  ;;  %v550_v57 = vpop.permute.xlu2 %549 }
  0xc6   : > { %472 = vst.msk [vmem:[#allocation2 + $0xc8] sm:$0xff] %vm446_vm2, %v401_v39 }
  0xc7   : > { %643 = vst.msk [vmem:[#allocation2 + $0x18] sm:$0xff] %vm639_vm3, %v550_v57 }
  0xca   : > { %747 = vrot.lane.b32.xlu0 %v2745_v0, %s2380_s20  ;;  %749 = vrot.lane.b32.xlu1 %v2751_v3, %s2380_s20 }
  0xcb   : > { %751 = vrot.lane.b32.xlu2 %v2764_v35, %s2380_s20 }
  0xcc   : > { %v405_v53 = vpop.permute.xlu0 %404  ;;  %v407_v59 = vpop.permute.xlu1 %406 }
  0xcd   : > { %474 = vst.msk [vmem:[#allocation2 + $0xd8] sm:$0xff] %vm446_vm2, %v405_v53  ;;  %v556_v52 = vpop.permute.xlu2 %555 }
  0xce   : > { %475 = vst.msk [vmem:[#allocation2 + $0xe0] sm:$0xff] %vm446_vm2, %v407_v59 }
  0xcf   : > { %646 = vst.msk [vmem:[#allocation2 + $0x30] sm:$0xff] %vm639_vm3, %v556_v52 }
  0xd2   : > { %753 = vrot.lane.b32.xlu0 %v2769_v40, %s2380_s20  ;;  %755 = vrot.lane.b32.xlu1 %v2784_v54, %s2380_s20 }
  0xd3   : > { %757 = vrot.lane.b32.xlu2 %v2791_v48, %s2380_s20 }
  0xd4   : > { %v411_v39 = vpop.permute.xlu0 %410  ;;  %v413_v3 = vpop.permute.xlu1 %412 }
  0xd5   : > { %477 = vst.msk [vmem:[#allocation2 + $0xf0] sm:$0xff] %vm446_vm2, %v411_v39  ;;  %v562_v38 = vpop.permute.xlu2 %561 }
  0xd6   : > { %478 = vst.msk [vmem:[#allocation2 + $0xf8] sm:$0xff] %vm446_vm2, %v413_v3 }
  0xd7   : > { %649 = vst.msk [vmem:[#allocation2 + $0x48] sm:$0xff] %vm639_vm3, %v562_v38  ;;  %v2138_v38 = vld [vmem:[%s2420_s17 + $0x188] sm:$0xff] }
  0xda   : > { %759 = vrot.lane.b32.xlu0 %v2802_v33, %s2380_s20  ;;  %761 = vrot.lane.b32.xlu1 %v2806_v51, %s2380_s20 }
  0xdb   : > { %763 = vrot.lane.b32.xlu2 %v2823_v60, %s2380_s20 }
  0xdc   : > { %v546_v41 = vpop.permute.xlu0 %545  ;;  %v548_v54 = vpop.permute.xlu1 %547 }
  0xdd   : > { %641 = vst.msk [vmem:[#allocation2 + $0x8] sm:$0xff] %vm639_vm3, %v546_v41  ;;  %v568_v49 = vpop.permute.xlu2 %567 }
  0xde   : > { %642 = vst.msk [vmem:[#allocation2 + $0x10] sm:$0xff] %vm639_vm3, %v548_v54 }
  0xdf   : > { %652 = vst.msk [vmem:[#allocation2 + $0x60] sm:$0xff] %vm639_vm3, %v568_v49 }
  0xe2   : > { %765 = vrot.lane.b32.xlu0 %v2827_v62, %s2380_s20  ;;  %767 = vrot.lane.b32.xlu1 %v2833_v61, %s2380_s20 }
  0xe3   : > { %769 = vrot.lane.b32.xlu2 %v2846_v58, %s2380_s20 }
  0xe4   : > { %v552_v57 = vpop.permute.xlu0 %551  ;;  %v554_v51 = vpop.permute.xlu1 %553 }
  0xe5   : > { %644 = vst.msk [vmem:[#allocation2 + $0x20] sm:$0xff] %vm639_vm3, %v552_v57  ;;  %v574_v53 = vpop.permute.xlu2 %573 }
  0xe6   : > { %645 = vst.msk [vmem:[#allocation2 + $0x28] sm:$0xff] %vm639_vm3, %v554_v51 }
  0xe7   : > { %655 = vst.msk [vmem:[#allocation2 + $0x78] sm:$0xff] %vm639_vm3, %v574_v53  ;;  %v3162_v53 = vld [vmem:[%s2420_s17 + $0x189] sm:$0xff] }
  0xea   : > { %771 = vrot.lane.b32.xlu0 %v2851_v44, %s2380_s20  ;;  %773 = vrot.lane.b32.xlu1 %v2866_v46, %s2380_s20 }
  0xeb   : > { %775 = vrot.lane.b32.xlu2 %v2873_v32, %s2380_s20 }
  0xec   : > { %v558_v59 = vpop.permute.xlu0 %557  ;;  %v560_v61 = vpop.permute.xlu1 %559 }
  0xed   : > { %647 = vst.msk [vmem:[#allocation2 + $0x38] sm:$0xff] %vm639_vm3, %v558_v59  ;;  %v580_v52 = vpop.permute.xlu2 %579 }
  0xee   : > { %648 = vst.msk [vmem:[#allocation2 + $0x40] sm:$0xff] %vm639_vm3, %v560_v61 }
  0xef   : > { %658 = vst.msk [vmem:[#allocation2 + $0x90] sm:$0xff] %vm639_vm3, %v580_v52  ;;  %v3791_v52 = vld [vmem:[#allocation4_spill] sm:$0xff] }
  0xf2   : > { %777 = vrot.lane.b32.xlu0 %v2884_v45, %s2380_s20  ;;  %779 = vrot.lane.b32.xlu1 %v2888_v50, %s2380_s20 }
  0xf3   : > { %781 = vrot.lane.b32.xlu2 %v2905_v42, %s2380_s20 }
  0xf4   : > { %v564_v39 = vpop.permute.xlu0 %563  ;;  %v566_v46 = vpop.permute.xlu1 %565 }
  0xf5   : > { %650 = vst.msk [vmem:[#allocation2 + $0x50] sm:$0xff] %vm639_vm3, %v564_v39  ;;  %v586_v32 = vpop.permute.xlu2 %585  ;;  %v3792_v39 = vld [vmem:[#allocation5_spill] sm:$0xff] }
  0xf6   : > { %651 = vst.msk [vmem:[#allocation2 + $0x58] sm:$0xff] %vm639_vm3, %v566_v46 }
  0xf7   : > { %661 = vst.msk [vmem:[#allocation2 + $0xa8] sm:$0xff] %vm639_vm3, %v586_v32 }
  0xfa   : > { %783 = vrot.lane.b32.xlu0 %v2911_v56, %s2380_s20  ;;  %785 = vrot.lane.b32.xlu1 %v2915_v55, %s2380_s20 }
  0xfb   : > { %787 = vrot.lane.b32.xlu2 %v2928_v34, %s2380_s20  ;;  %v2137_v34 = vld [vmem:[%s2420_s17 + $0x180] sm:$0xff] }
  0xfc   : > { %v570_v45 = vpop.permute.xlu0 %569  ;;  %v572_v50 = vpop.permute.xlu1 %571 }
  0xfd   : > { %653 = vst.msk [vmem:[#allocation2 + $0x68] sm:$0xff] %vm639_vm3, %v570_v45  ;;  %v592_v42 = vpop.permute.xlu2 %591  ;;  %v3793_v45 = vld [vmem:[#allocation6_spill] sm:$0xff] }
  0xfe   : > { %654 = vst.msk [vmem:[#allocation2 + $0x70] sm:$0xff] %vm639_vm3, %v572_v50 }
  0xff   : > { %664 = vst.msk [vmem:[#allocation2 + $0xc0] sm:$0xff] %vm639_vm3, %v592_v42  ;;  %v3794_v42 = vld [vmem:[#allocation7_spill] sm:$0xff] }
 0x102   : > { %789 = vrot.lane.b32.xlu0 %v2941_v47, %s2380_s20  ;;  %791 = vrot.lane.b32.xlu1 %v2948_v36, %s2380_s20 }
 0x103   : > { %793 = vrot.lane.b32.xlu2 %v2955_v43, %s2380_s20 }
 0x104   : > { %v576_v55 = vpop.permute.xlu0 %575  ;;  %v578_v56 = vpop.permute.xlu1 %577 }
 0x105   : > { %656 = vst.msk [vmem:[#allocation2 + $0x80] sm:$0xff] %vm639_vm3, %v576_v55  ;;  %v598_v3 = vpop.permute.xlu2 %597  ;;  %v3795_v55 = vld [vmem:[#allocation8_spill] sm:$0xff] }
 0x106   : > { %657 = vst.msk [vmem:[#allocation2 + $0x88] sm:$0xff] %vm639_vm3, %v578_v56 }
 0x107   : > { %667 = vst.msk [vmem:[#allocation2 + $0xd8] sm:$0xff] %vm639_vm3, %v598_v3  ;;  %v3796_v3 = vld [vmem:[#allocation9_spill] sm:$0xff] }
 0x10a   : > { %795 = vrot.lane.b32.xlu0 %v2970_v37, %s2380_s20  ;;  %797 = vrot.lane.b32.xlu1 %v2137_v34, %s2380_s20 }
 0x10b   : > { %799 = vrot.lane.b32.xlu2 %v2138_v38, %s2380_s20 }
 0x10c   : > { %v582_v41 = vpop.permute.xlu0 %581  ;;  %v584_v54 = vpop.permute.xlu1 %583 }
 0x10d   : > { %659 = vst.msk [vmem:[#allocation2 + $0x98] sm:$0xff] %vm639_vm3, %v582_v41  ;;  %v604_v49 = vpop.permute.xlu2 %603  ;;  %v3797_v41 = vld [vmem:[#allocation10_spill] sm:$0xff] }
 0x10e   : > { %660 = vst.msk [vmem:[#allocation2 + $0xa0] sm:$0xff] %vm639_vm3, %v584_v54  ;;  %v3798_v54 = vld [vmem:[#allocation11_spill] sm:$0xff] }
 0x10f   : > { %670 = vst.msk [vmem:[#allocation2 + $0xf0] sm:$0xff] %vm639_vm3, %v604_v49 }
 0x112   : > { %930 = vrot.lane.b32.xlu0 %v2424_v1, %s2381_s21  ;;  %932 = vrot.lane.b32.xlu1 %v2436_v4, %s2381_s21 }
 0x113   : > { %934 = vrot.lane.b32.xlu2 %v2430_v2, %s2381_s21 }
 0x114   : > { %v588_v37 = vpop.permute.xlu0 %587  ;;  %v590_v57 = vpop.permute.xlu1 %589 }
 0x115   : > { %662 = vst.msk [vmem:[#allocation2 + $0xb0] sm:$0xff] %vm639_vm3, %v588_v37  ;;  %v740_v51 = vpop.permute.xlu2 %739 }
 0x116   : > { %663 = vst.msk [vmem:[#allocation2 + $0xb8] sm:$0xff] %vm639_vm3, %v590_v57  ;;  %v3799_v57 = vld [vmem:[#allocation12_spill] sm:$0xff] }
 0x117   : > { %835 = vst.msk [vmem:[#allocation2 + $0x8] sm:$0xff] %vm833_vm4, %v740_v51 }
 0x11a   : > { %936 = vrot.lane.b32.xlu0 %v2442_v5, %s2381_s21  ;;  %938 = vrot.lane.b32.xlu1 %v2447_v6, %s2381_s21 }
 0x11b   : > { %940 = vrot.lane.b32.xlu2 %v2450_v7, %s2381_s21 }
 0x11c   : > { %v594_v1 = vpop.permute.xlu0 %593  ;;  %v596_v4 = vpop.permute.xlu1 %595 }
 0x11d   : > { %665 = vst.msk [vmem:[#allocation2 + $0xc8] sm:$0xff] %vm639_vm3, %v594_v1  ;;  %v746_v2 = vpop.permute.xlu2 %745  ;;  %v3800_v1 = vld [vmem:[#allocation13_spill] sm:$0xff] }
 0x11e   : > { %666 = vst.msk [vmem:[#allocation2 + $0xd0] sm:$0xff] %vm639_vm3, %v596_v4  ;;  %v3801_v4 = vld [vmem:[#allocation14_spill] sm:$0xff] }
 0x11f   : > { %838 = vst.msk [vmem:[#allocation2 + $0x20] sm:$0xff] %vm833_vm4, %v746_v2 }
 0x122   : > { %942 = vrot.lane.b32.xlu0 %v2457_v8, %s2381_s21  ;;  %944 = vrot.lane.b32.xlu1 %v2462_v9, %s2381_s21 }
 0x123   : > { %946 = vrot.lane.b32.xlu2 %v2465_v10, %s2381_s21 }
 0x124   : > { %v600_v5 = vpop.permute.xlu0 %599  ;;  %v602_v6 = vpop.permute.xlu1 %601 }
 0x125   : > { %668 = vst.msk [vmem:[#allocation2 + $0xe0] sm:$0xff] %vm639_vm3, %v600_v5  ;;  %v752_v7 = vpop.permute.xlu2 %751 }
 0x126   : > { %669 = vst.msk [vmem:[#allocation2 + $0xe8] sm:$0xff] %vm639_vm3, %v602_v6  ;;  %v3802_v6 = vld [vmem:[#allocation15_spill] sm:$0xff] }
 0x127   : > { %841 = vst.msk [vmem:[#allocation2 + $0x38] sm:$0xff] %vm833_vm4, %v752_v7 }
 0x12a   : > { %948 = vrot.lane.b32.xlu0 %v2472_v11, %s2381_s21  ;;  %950 = vrot.lane.b32.xlu1 %v2477_v12, %s2381_s21 }
 0x12b   : > { %952 = vrot.lane.b32.xlu2 %v2480_v13, %s2381_s21 }
 0x12c   : > { %v606_v8 = vpop.permute.xlu0 %605  ;;  %v738_v9 = vpop.permute.xlu1 %737 }
 0x12d   : > { %671 = vst.msk [vmem:[#allocation2 + $0xf8] sm:$0xff] %vm639_vm3, %v606_v8  ;;  %v758_v10 = vpop.permute.xlu2 %757  ;;  %v3803_v8 = vld [vmem:[#allocation16_spill] sm:$0xff] }
 0x12e   : > { %834 = vst.msk [vmem:[#allocation2] sm:$0xff] %vm833_vm4, %v738_v9  ;;  %v3804_v9 = vld [vmem:[#allocation17_spill] sm:$0xff] }
 0x12f   : > { %844 = vst.msk [vmem:[#allocation2 + $0x50] sm:$0xff] %vm833_vm4, %v758_v10 }
 0x132   : > { %954 = vrot.lane.b32.xlu0 %v2487_v14, %s2381_s21  ;;  %956 = vrot.lane.b32.xlu1 %v2492_v15, %s2381_s21 }
 0x133   : > { %958 = vrot.lane.b32.xlu2 %v2495_v16, %s2381_s21 }
 0x134   : > { %v742_v11 = vpop.permute.xlu0 %741  ;;  %v744_v12 = vpop.permute.xlu1 %743 }
 0x135   : > { %836 = vst.msk [vmem:[#allocation2 + $0x10] sm:$0xff] %vm833_vm4, %v742_v11  ;;  %v764_v13 = vpop.permute.xlu2 %763 }
 0x136   : > { %837 = vst.msk [vmem:[#allocation2 + $0x18] sm:$0xff] %vm833_vm4, %v744_v12  ;;  %v3805_v12 = vld [vmem:[#allocation18_spill] sm:$0xff] }
 0x137   : > { %847 = vst.msk [vmem:[#allocation2 + $0x68] sm:$0xff] %vm833_vm4, %v764_v13 }
 0x13a   : > { %960 = vrot.lane.b32.xlu0 %v2502_v17, %s2381_s21  ;;  %962 = vrot.lane.b32.xlu1 %v2507_v18, %s2381_s21 }
 0x13b   : > { %964 = vrot.lane.b32.xlu2 %v2510_v19, %s2381_s21 }
 0x13c   : > { %v748_v14 = vpop.permute.xlu0 %747  ;;  %v750_v15 = vpop.permute.xlu1 %749 }
 0x13d   : > { %839 = vst.msk [vmem:[#allocation2 + $0x28] sm:$0xff] %vm833_vm4, %v748_v14  ;;  %v770_v16 = vpop.permute.xlu2 %769  ;;  %v3806_v14 = vld [vmem:[#allocation19_spill] sm:$0xff] }
 0x13e   : > { %840 = vst.msk [vmem:[#allocation2 + $0x30] sm:$0xff] %vm833_vm4, %v750_v15  ;;  %v3807_v15 = vld [vmem:[#allocation20_spill] sm:$0xff] }
 0x13f   : > { %850 = vst.msk [vmem:[#allocation2 + $0x80] sm:$0xff] %vm833_vm4, %v770_v16 }
 0x142   : > { %966 = vrot.lane.b32.xlu0 %v2517_v20, %s2381_s21  ;;  %968 = vrot.lane.b32.xlu1 %v2522_v21, %s2381_s21 }
 0x143   : > { %970 = vrot.lane.b32.xlu2 %v2525_v22, %s2381_s21 }
 0x144   : > { %v754_v17 = vpop.permute.xlu0 %753  ;;  %v756_v18 = vpop.permute.xlu1 %755 }
 0x145   : > { %842 = vst.msk [vmem:[#allocation2 + $0x40] sm:$0xff] %vm833_vm4, %v754_v17  ;;  %v776_v19 = vpop.permute.xlu2 %775 }
 0x146   : > { %843 = vst.msk [vmem:[#allocation2 + $0x48] sm:$0xff] %vm833_vm4, %v756_v18  ;;  %v3808_v18 = vld [vmem:[#allocation21_spill] sm:$0xff] }
 0x147   : > { %853 = vst.msk [vmem:[#allocation2 + $0x98] sm:$0xff] %vm833_vm4, %v776_v19 }
 0x14a   : > { %972 = vrot.lane.b32.xlu0 %v2532_v23, %s2381_s21  ;;  %974 = vrot.lane.b32.xlu1 %v2537_v24, %s2381_s21 }
 0x14b   : > { %976 = vrot.lane.b32.xlu2 %v2540_v25, %s2381_s21 }
 0x14c   : > { %v760_v20 = vpop.permute.xlu0 %759  ;;  %v762_v21 = vpop.permute.xlu1 %761 }
 0x14d   : > { %845 = vst.msk [vmem:[#allocation2 + $0x58] sm:$0xff] %vm833_vm4, %v760_v20  ;;  %v782_v22 = vpop.permute.xlu2 %781  ;;  %v3809_v20 = vld [vmem:[#allocation22_spill] sm:$0xff] }
 0x14e   : > { %846 = vst.msk [vmem:[#allocation2 + $0x60] sm:$0xff] %vm833_vm4, %v762_v21  ;;  %v3810_v21 = vld [vmem:[#allocation23_spill] sm:$0xff] }
 0x14f   : > { %856 = vst.msk [vmem:[#allocation2 + $0xb0] sm:$0xff] %vm833_vm4, %v782_v22 }
 0x152   : > { %978 = vrot.lane.b32.xlu0 %v2547_v26, %s2381_s21  ;;  %980 = vrot.lane.b32.xlu1 %v2552_v27, %s2381_s21 }
 0x153   : > { %982 = vrot.lane.b32.xlu2 %v2555_v28, %s2381_s21  ;;  %v3159_v28 = vld [vmem:[%s2420_s17 + $0x181] sm:$0xff] }
 0x154   : > { %v766_v23 = vpop.permute.xlu0 %765  ;;  %v768_v24 = vpop.permute.xlu1 %767 }
 0x155   : > { %848 = vst.msk [vmem:[#allocation2 + $0x70] sm:$0xff] %vm833_vm4, %v766_v23  ;;  %v788_v25 = vpop.permute.xlu2 %787 }
 0x156   : > { %849 = vst.msk [vmem:[#allocation2 + $0x78] sm:$0xff] %vm833_vm4, %v768_v24  ;;  %v3811_v24 = vld [vmem:[#allocation24_spill] sm:$0xff] }
 0x157   : > { %859 = vst.msk [vmem:[#allocation2 + $0xc8] sm:$0xff] %vm833_vm4, %v788_v25 }
 0x15a   : > { %984 = vrot.lane.b32.xlu0 %v2562_v29, %s2381_s21  ;;  %986 = vrot.lane.b32.xlu1 %v2567_v30, %s2381_s21 }
 0x15b   : > { %988 = vrot.lane.b32.xlu2 %v2570_v31, %s2381_s21  ;;  %v3790_v31 = vld [vmem:[#allocation3_spill] sm:$0xff] }
 0x15c   : > { %v772_v26 = vpop.permute.xlu0 %771  ;;  %v774_v27 = vpop.permute.xlu1 %773 }
 0x15d   : > { %851 = vst.msk [vmem:[#allocation2 + $0x88] sm:$0xff] %vm833_vm4, %v772_v26  ;;  %v794_v59 = vpop.permute.xlu2 %793  ;;  %v3812_v26 = vld [vmem:[#allocation25_spill] sm:$0xff] }
 0x15e   : > { %852 = vst.msk [vmem:[#allocation2 + $0x90] sm:$0xff] %vm833_vm4, %v774_v27  ;;  %v3813_v27 = vld [vmem:[#allocation26_spill] sm:$0xff] }
 0x15f   : > { %862 = vst.msk [vmem:[#allocation2 + $0xe0] sm:$0xff] %vm833_vm4, %v794_v59 }
 0x162   : > { %990 = vrot.lane.b32.xlu0 %v3159_v28, %s2381_s21  ;;  %992 = vrot.lane.b32.xlu1 %v3162_v53, %s2381_s21 }
 0x163   : > { %1123 = vrot.lane.b32.xlu2 %v3790_v31, %s2382_s22 }
 0x164   : > { %v778_v29 = vpop.permute.xlu0 %777  ;;  %v780_v30 = vpop.permute.xlu1 %779 }
 0x165   : > { %854 = vst.msk [vmem:[#allocation2 + $0xa0] sm:$0xff] %vm833_vm4, %v778_v29  ;;  %v800_v61 = vpop.permute.xlu2 %799 }
 0x166   : > { %855 = vst.msk [vmem:[#allocation2 + $0xa8] sm:$0xff] %vm833_vm4, %v780_v30  ;;  %v3814_v30 = vld [vmem:[#allocation27_spill] sm:$0xff] }
 0x167   : > { %865 = vst.msk [vmem:[#allocation2 + $0xf8] sm:$0xff] %vm833_vm4, %v800_v61  ;;  %v3815_v61 = vld [vmem:[#allocation28_spill] sm:$0xff] }
 0x16a   : > { %1125 = vrot.lane.b32.xlu0 %v3791_v52, %s2382_s22  ;;  %1127 = vrot.lane.b32.xlu1 %v3792_v39, %s2382_s22  ;;  %v3816_v52 = vld [vmem:[#allocation29_spill] sm:$0xff] }
 0x16b   : > { %1129 = vrot.lane.b32.xlu2 %v3793_v45, %s2382_s22 }
 0x16c   : > { %v784_v46 = vpop.permute.xlu0 %783  ;;  %v786_v32 = vpop.permute.xlu1 %785 }
 0x16d   : > { %857 = vst.msk [vmem:[#allocation2 + $0xb8] sm:$0xff] %vm833_vm4, %v784_v46  ;;  %v935_v50 = vpop.permute.xlu2 %934 }
 0x16e   : > { %858 = vst.msk [vmem:[#allocation2 + $0xc0] sm:$0xff] %vm833_vm4, %v786_v32  ;;  %v3817_v32 = vld [vmem:[#allocation30_spill] sm:$0xff] }
 0x16f   : > { %1029 = vst.msk [vmem:[#allocation2 + $0x10] sm:$0xff] %vm1026_vm5, %v935_v50  ;;  %v3818_v50 = vld [vmem:[#allocation31_spill] sm:$0xff] }
 0x172   : > { %1131 = vrot.lane.b32.xlu0 %v3794_v42, %s2382_s22  ;;  %1133 = vrot.lane.b32.xlu1 %v3795_v55, %s2382_s22  ;;  %v3819_v42 = vld [vmem:[#allocation32_spill] sm:$0xff] }
 0x173   : > { %1135 = vrot.lane.b32.xlu2 %v3796_v3, %s2382_s22  ;;  %v3260_v55 = vld [vmem:[%s2420_s17 + $0x182] sm:$0xff]  ;;  %v3267_v3 = vld [vmem:[%s2420_s17 + $0x18a] sm:$0xff] }
 0x174   : > { %v790_v56 = vpop.permute.xlu0 %789  ;;  %v792_v34 = vpop.permute.xlu1 %791 }
 0x175   : > { %860 = vst.msk [vmem:[#allocation2 + $0xd0] sm:$0xff] %vm833_vm4, %v790_v56  ;;  %v941_v38 = vpop.permute.xlu2 %940 }
 0x176   : > { %861 = vst.msk [vmem:[#allocation2 + $0xd8] sm:$0xff] %vm833_vm4, %v792_v34 }
 0x177   : > { %1032 = vst.msk [vmem:[#allocation2 + $0x28] sm:$0xff] %vm1026_vm5, %v941_v38  ;;  %v2203_v38 = vld [vmem:[%s2420_s17 + $0x30] sm:$0xff] }
 0x17a   : > { %1137 = vrot.lane.b32.xlu0 %v3797_v41, %s2382_s22  ;;  %1139 = vrot.lane.b32.xlu1 %v3798_v54, %s2382_s22  ;;  %v2204_v54 = vld [vmem:[%s2420_s17 + $0x38] sm:$0xff] }
 0x17b   : > { %1141 = vrot.lane.b32.xlu2 %v3799_v57, %s2382_s22 }
 0x17c   : > { %v796_v49 = vpop.permute.xlu0 %795  ;;  %v798_v37 = vpop.permute.xlu1 %797 }
 0x17d   : > { %863 = vst.msk [vmem:[#allocation2 + $0xe8] sm:$0xff] %vm833_vm4, %v796_v49  ;;  %v947_v51 = vpop.permute.xlu2 %946 }
 0x17e   : > { %864 = vst.msk [vmem:[#allocation2 + $0xf0] sm:$0xff] %vm833_vm4, %v798_v37 }
 0x17f   : > { %1035 = vst.msk [vmem:[#allocation2 + $0x40] sm:$0xff] %vm1026_vm5, %v947_v51  ;;  %v2207_v51 = vld [vmem:[%s2420_s17 + $0x60] sm:$0xff] }
 0x182   : > { %1143 = vrot.lane.b32.xlu0 %v3800_v1, %s2382_s22  ;;  %1145 = vrot.lane.b32.xlu1 %v3801_v4, %s2382_s22 }
 0x183   : > { %1147 = vrot.lane.b32.xlu2 %v3802_v6, %s2382_s22 }
 0x184   : > { %v931_v2 = vpop.permute.xlu0 %930  ;;  %v933_v5 = vpop.permute.xlu1 %932 }
 0x185   : > { %1027 = vst.msk [vmem:[#allocation2] sm:$0xff] %vm1026_vm5, %v931_v2  ;;  %v953_v7 = vpop.permute.xlu2 %952 }
 0x186   : > { %1028 = vst.msk [vmem:[#allocation2 + $0x8] sm:$0xff] %vm1026_vm5, %v933_v5 }
 0x187   : > { %1038 = vst.msk [vmem:[#allocation2 + $0x58] sm:$0xff] %vm1026_vm5, %v953_v7 }
 0x18a   : > { %1149 = vrot.lane.b32.xlu0 %v3803_v8, %s2382_s22  ;;  %1151 = vrot.lane.b32.xlu1 %v3804_v9, %s2382_s22 }
 0x18b   : > { %1153 = vrot.lane.b32.xlu2 %v3805_v12, %s2382_s22  ;;  %v2251_v12 = vld [vmem:[%s2420_s17 + $0xf1] sm:$0xff] }
 0x18c   : > { %v937_v10 = vpop.permute.xlu0 %936  ;;  %v939_v11 = vpop.permute.xlu1 %938 }
 0x18d   : > { %1030 = vst.msk [vmem:[#allocation2 + $0x18] sm:$0xff] %vm1026_vm5, %v937_v10  ;;  %v959_v13 = vpop.permute.xlu2 %958 }
 0x18e   : > { %1031 = vst.msk [vmem:[#allocation2 + $0x20] sm:$0xff] %vm1026_vm5, %v939_v11 }
 0x18f   : > { %1041 = vst.msk [vmem:[#allocation2 + $0x70] sm:$0xff] %vm1026_vm5, %v959_v13 }
 0x192   : > { %1155 = vrot.lane.b32.xlu0 %v3806_v14, %s2382_s22  ;;  %1157 = vrot.lane.b32.xlu1 %v3807_v15, %s2382_s22  ;;  %v2283_v15 = vld [vmem:[%s2420_s17 + $0xf2] sm:$0xff] }
 0x193   : > { %1159 = vrot.lane.b32.xlu2 %v3808_v18, %s2382_s22 }
 0x194   : > { %v943_v16 = vpop.permute.xlu0 %942  ;;  %v945_v17 = vpop.permute.xlu1 %944 }
 0x195   : > { %1033 = vst.msk [vmem:[#allocation2 + $0x30] sm:$0xff] %vm1026_vm5, %v943_v16  ;;  %v965_v19 = vpop.permute.xlu2 %964  ;;  %v2291_v16 = vld [vmem:[%s2420_s17 + $0x152] sm:$0xff] }
 0x196   : > { %1034 = vst.msk [vmem:[#allocation2 + $0x38] sm:$0xff] %vm1026_vm5, %v945_v17 }
 0x197   : > { %1044 = vst.msk [vmem:[#allocation2 + $0x88] sm:$0xff] %vm1026_vm5, %v965_v19 }
 0x19a   : > { %1161 = vrot.lane.b32.xlu0 %v3809_v20, %s2382_s22  ;;  %1163 = vrot.lane.b32.xlu1 %v3810_v21, %s2382_s22  ;;  %v2243_v20 = vld [vmem:[%s2420_s17 + $0x91] sm:$0xff] }
 0x19b   : > { %1165 = vrot.lane.b32.xlu2 %v3811_v24, %s2382_s22  ;;  %v2220_v21 = vld [vmem:[%s2420_s17 + $0xf8] sm:$0xff] }
 0x19c   : > { %v949_v22 = vpop.permute.xlu0 %948  ;;  %v951_v23 = vpop.permute.xlu1 %950 }
 0x19d   : > { %1036 = vst.msk [vmem:[#allocation2 + $0x48] sm:$0xff] %vm1026_vm5, %v949_v22  ;;  %v971_v25 = vpop.permute.xlu2 %970 }
 0x19e   : > { %1037 = vst.msk [vmem:[#allocation2 + $0x50] sm:$0xff] %vm1026_vm5, %v951_v23 }
 0x19f   : > { %1047 = vst.msk [vmem:[#allocation2 + $0xa0] sm:$0xff] %vm1026_vm5, %v971_v25  ;;  %v2267_v25 = vld [vmem:[%s2420_s17 + $0x32] sm:$0xff] }
 0x1a2   : > { %1167 = vrot.lane.b32.xlu0 %v3812_v26, %s2382_s22  ;;  %1169 = vrot.lane.b32.xlu1 %v3813_v27, %s2382_s22  ;;  %v2275_v26 = vld [vmem:[%s2420_s17 + $0x92] sm:$0xff] }
 0x1a3   : > { %1171 = vrot.lane.b32.xlu2 %v3814_v30, %s2382_s22 }
 0x1a4   : > { %v955_v59 = vpop.permute.xlu0 %954  ;;  %v957_v29 = vpop.permute.xlu1 %956 }
 0x1a5   : > { %1039 = vst.msk [vmem:[#allocation2 + $0x60] sm:$0xff] %vm1026_vm5, %v955_v59  ;;  %v977_v31 = vpop.permute.xlu2 %976  ;;  %v2252_v59 = vld [vmem:[%s2420_s17 + $0xf9] sm:$0xff] }
 0x1a6   : > { %1040 = vst.msk [vmem:[#allocation2 + $0x68] sm:$0xff] %vm1026_vm5, %v957_v29 }
 0x1a7   : > { %1050 = vst.msk [vmem:[#allocation2 + $0xb8] sm:$0xff] %vm1026_vm5, %v977_v31  ;;  %v2284_v31 = vld [vmem:[%s2420_s17 + $0xfa] sm:$0xff] }
 0x1aa   : > { %1173 = vrot.lane.b32.xlu0 %v3815_v61, %s2382_s22  ;;  %1175 = vrot.lane.b32.xlu1 %v3816_v52, %s2382_s22  ;;  %v2292_v52 = vld [vmem:[%s2420_s17 + $0x15a] sm:$0xff] }
 0x1ab   : > { %1177 = vrot.lane.b32.xlu2 %v3817_v32, %s2382_s22  ;;  %v2236_v32 = vld [vmem:[%s2420_s17 + $0x39] sm:$0xff] }
 0x1ac   : > { %v961_v39 = vpop.permute.xlu0 %960  ;;  %v963_v46 = vpop.permute.xlu1 %962 }
 0x1ad   : > { %1042 = vst.msk [vmem:[#allocation2 + $0x78] sm:$0xff] %vm1026_vm5, %v961_v39  ;;  %v983_v45 = vpop.permute.xlu2 %982 }
 0x1ae   : > { %1043 = vst.msk [vmem:[#allocation2 + $0x80] sm:$0xff] %vm1026_vm5, %v963_v46 }
 0x1af   : > { %1053 = vst.msk [vmem:[#allocation2 + $0xd0] sm:$0xff] %vm1026_vm5, %v983_v45  ;;  %v2244_v45 = vld [vmem:[%s2420_s17 + $0x99] sm:$0xff] }
 0x1b2   : > { %1179 = vrot.lane.b32.xlu0 %v3818_v50, %s2382_s22  ;;  %1181 = vrot.lane.b32.xlu1 %v3819_v42, %s2382_s22  ;;  %v2221_v42 = vld [vmem:[%s2420_s17 + $0x108] sm:$0xff] }
 0x1b3   : > { %1183 = vrot.lane.b32.xlu2 %v3260_v55, %s2382_s22 }
 0x1b4   : > { %v967_v56 = vpop.permute.xlu0 %966  ;;  %v969_v34 = vpop.permute.xlu1 %968 }
 0x1b5   : > { %1045 = vst.msk [vmem:[#allocation2 + $0x90] sm:$0xff] %vm1026_vm5, %v967_v56  ;;  %v989_v41 = vpop.permute.xlu2 %988 }
 0x1b6   : > { %1046 = vst.msk [vmem:[#allocation2 + $0x98] sm:$0xff] %vm1026_vm5, %v969_v34 }
 0x1b7   : > { %1056 = vst.msk [vmem:[#allocation2 + $0xe8] sm:$0xff] %vm1026_vm5, %v989_v41 }
 0x1ba   : > { %1185 = vrot.lane.b32.xlu0 %v3267_v3, %s2382_s22  ;;  %1317 = vrot.lane.b32.xlu1 %v2203_v38, %s2383_s23  ;;  %v2268_v38 = vld [vmem:[%s2420_s17 + $0x3a] sm:$0xff] }
 0x1bb   : > { %1319 = vrot.lane.b32.xlu2 %v2204_v54, %s2383_s23  ;;  %v2276_v54 = vld [vmem:[%s2420_s17 + $0x9a] sm:$0xff] }
 0x1bc   : > { %v973_v49 = vpop.permute.xlu0 %972  ;;  %v975_v37 = vpop.permute.xlu1 %974 }
 0x1bd   : > { %1048 = vst.msk [vmem:[#allocation2 + $0xa8] sm:$0xff] %vm1026_vm5, %v973_v49  ;;  %v1124_v57 = vpop.permute.xlu2 %1123 }
 0x1be   : > { %1049 = vst.msk [vmem:[#allocation2 + $0xb0] sm:$0xff] %vm1026_vm5, %v975_v37 }
 0x1bf   : > { %1220 = vst.msk [vmem:[#allocation2] sm:$0xff] %vm1219_vm6, %v1124_v57  ;;  %v2253_v57 = vld [vmem:[%s2420_s17 + $0x109] sm:$0xff] }
 0x1c2   : > { %1321 = vrot.lane.b32.xlu0 %v2741_v63, %s2383_s23  ;;  %1323 = vrot.lane.b32.xlu1 %v2745_v0, %s2383_s23  ;;  %v2210_v63 = vld [vmem:[%s2420_s17 + $0x80] sm:$0xff] }
 0x1c3   : > { %1325 = vrot.lane.b32.xlu2 %v2207_v51, %s2383_s23  ;;  %v2261_v51 = vld [vmem:[%s2420_s17 + $0x169] sm:$0xff] }
 0x1c4   : > { %v979_v1 = vpop.permute.xlu0 %978  ;;  %v981_v4 = vpop.permute.xlu1 %980 }
 0x1c5   : > { %1051 = vst.msk [vmem:[#allocation2 + $0xc0] sm:$0xff] %vm1026_vm5, %v979_v1  ;;  %v1130_v2 = vpop.permute.xlu2 %1129 }
 0x1c6   : > { %1052 = vst.msk [vmem:[#allocation2 + $0xc8] sm:$0xff] %vm1026_vm5, %v981_v4 }
 0x1c7   : > { %1223 = vst.msk [vmem:[#allocation2 + $0x18] sm:$0xff] %vm1219_vm6, %v1130_v2 }
 0x1ca   : > { %1327 = vrot.lane.b32.xlu0 %v2764_v35, %s2383_s23  ;;  %1329 = vrot.lane.b32.xlu1 %v2769_v40, %s2383_s23  ;;  %v2213_v35 = vld [vmem:[%s2420_s17 + $0xa8] sm:$0xff] }
 0x1cb   : > { %1331 = vrot.lane.b32.xlu2 %v2210_v63, %s2383_s23  ;;  %v2293_v63 = vld [vmem:[%s2420_s17 + $0x16a] sm:$0xff] }
 0x1cc   : > { %v985_v0 = vpop.permute.xlu0 %984  ;;  %v987_v5 = vpop.permute.xlu1 %986 }
 0x1cd   : > { %1054 = vst.msk [vmem:[#allocation2 + $0xd8] sm:$0xff] %vm1026_vm5, %v985_v0  ;;  %v1136_v6 = vpop.permute.xlu2 %1135  ;;  %v2237_v0 = vld [vmem:[%s2420_s17 + $0x49] sm:$0xff] }
 0x1ce   : > { %1055 = vst.msk [vmem:[#allocation2 + $0xe0] sm:$0xff] %vm1026_vm5, %v987_v5 }
 0x1cf   : > { %1226 = vst.msk [vmem:[#allocation2 + $0x30] sm:$0xff] %vm1219_vm6, %v1136_v6  ;;  %v2245_v6 = vld [vmem:[%s2420_s17 + $0xa9] sm:$0xff] }
 0x1d2   : > { %1333 = vrot.lane.b32.xlu0 %v2791_v48, %s2383_s23  ;;  %1335 = vrot.lane.b32.xlu1 %v2802_v33, %s2383_s23  ;;  %v2216_v33 = vld [vmem:[%s2420_s17 + $0xc8] sm:$0xff] }
 0x1d3   : > { %1337 = vrot.lane.b32.xlu2 %v2213_v35, %s2383_s23 }
 0x1d4   : > { %v991_v40 = vpop.permute.xlu0 %990  ;;  %v993_v7 = vpop.permute.xlu1 %992 }
 0x1d5   : > { %1057 = vst.msk [vmem:[#allocation2 + $0xf0] sm:$0xff] %vm1026_vm5, %v991_v40  ;;  %v1142_v8 = vpop.permute.xlu2 %1141 }
 0x1d6   : > { %1058 = vst.msk [vmem:[#allocation2 + $0xf8] sm:$0xff] %vm1026_vm5, %v993_v7  ;;  %v219_v7 = vld [vmem:[%s3727_s1 + $0x78] sm:$0xff] }
 0x1d7   : > { %1229 = vst.msk [vmem:[#allocation2 + $0x48] sm:$0xff] %vm1219_vm6, %v1142_v8  ;;  %v218_v8 = vld [vmem:[%s3727_s1 + $0x70] sm:$0xff]  ;;  %2303 = vmatpush.msra.mxu2 %v219_v7  ;;  %2304 = vmatpush.msra.mxu3 %v219_v7 }
 0x1d8   : > { %1867 = vmatpush.msra.mxu0 %v219_v7  ;;  %2302 = vmatpush.msra.mxu1 %v219_v7 }
 0x1d9   : > { %2306 = vmatpush.msra.mxu2 %v218_v8  ;;  %2307 = vmatpush.msra.mxu3 %v218_v8 }
 0x1da   : > { %1339 = vrot.lane.b32.xlu0 %v2823_v60, %s2383_s23  ;;  %1341 = vrot.lane.b32.xlu1 %v2827_v62, %s2383_s23  ;;  %v2219_v60 = vld [vmem:[%s2420_s17 + $0xf0] sm:$0xff] }
 0x1db   : > { %1343 = vrot.lane.b32.xlu2 %v2216_v33, %s2383_s23  ;;  %v2222_v33 = vld [vmem:[%s2420_s17 + $0x110] sm:$0xff]  ;;  %1868 = vmatpush.msra.mxu0 %v218_v8 }
 0x1dc   : > { %v1126_v48 = vpop.permute.xlu0 %1125  ;;  %v1128_v9 = vpop.permute.xlu1 %1127  ;;  %2305 = vmatpush.msra.mxu1 %v218_v8 }
 0x1dd   : > { %1221 = vst.msk [vmem:[#allocation2 + $0x8] sm:$0xff] %vm1219_vm6, %v1126_v48  ;;  %v1148_v10 = vpop.permute.xlu2 %1147  ;;  %v2230_v48 = vld [vmem:[%s2420_s17 + $0x170] sm:$0xff] }
 0x1de   : > { %1222 = vst.msk [vmem:[#allocation2 + $0x10] sm:$0xff] %vm1219_vm6, %v1128_v9 }
 0x1df   : > { %1232 = vst.msk [vmem:[#allocation2 + $0x60] sm:$0xff] %vm1219_vm6, %v1148_v10  ;;  %v217_v10 = vld [vmem:[%s3727_s1 + $0x68] sm:$0xff] }
 0x1e0   : > { %2309 = vmatpush.msra.mxu2 %v217_v10  ;;  %2310 = vmatpush.msra.mxu3 %v217_v10 }
 0x1e1   : > { %1869 = vmatpush.msra.mxu0 %v217_v10  ;;  %2308 = vmatpush.msra.mxu1 %v217_v10 }
 0x1e2   : > { %1345 = vrot.lane.b32.xlu0 %v2846_v58, %s2383_s23  ;;  %1347 = vrot.lane.b32.xlu1 %v2851_v44, %s2383_s23  ;;  %v2259_v58 = vld [vmem:[%s2420_s17 + $0x151] sm:$0xff] }
 0x1e3   : > { %1349 = vrot.lane.b32.xlu2 %v2219_v60, %s2383_s23  ;;  %v2269_v60 = vld [vmem:[%s2420_s17 + $0x4a] sm:$0xff] }
 0x1e4   : > { %v1132_v62 = vpop.permute.xlu0 %1131  ;;  %v1134_v11 = vpop.permute.xlu1 %1133 }
 0x1e5   : > { %1224 = vst.msk [vmem:[#allocation2 + $0x20] sm:$0xff] %vm1219_vm6, %v1132_v62  ;;  %v1154_v13 = vpop.permute.xlu2 %1153  ;;  %v216_v62 = vld [vmem:[%s3727_s1 + $0x60] sm:$0xff] }
 0x1e6   : > { %1225 = vst.msk [vmem:[#allocation2 + $0x28] sm:$0xff] %vm1219_vm6, %v1134_v11  ;;  %2312 = vmatpush.msra.mxu2 %v216_v62  ;;  %2313 = vmatpush.msra.mxu3 %v216_v62 }
 0x1e7   : > { %1235 = vst.msk [vmem:[#allocation2 + $0x78] sm:$0xff] %vm1219_vm6, %v1154_v13  ;;  %v215_v13 = vld [vmem:[%s3727_s1 + $0x58] sm:$0xff]  ;;  %1870 = vmatpush.msra.mxu0 %v216_v62  ;;  %2311 = vmatpush.msra.mxu1 %v216_v62  ;;  %v2240_v62 = vld [vmem:[%s2420_s17 + $0x69] sm:$0xff] }
 0x1e8   : > { %2315 = vmatpush.msra.mxu2 %v215_v13  ;;  %2316 = vmatpush.msra.mxu3 %v215_v13 }
 0x1e9   : > { %1871 = vmatpush.msra.mxu0 %v215_v13  ;;  %2314 = vmatpush.msra.mxu1 %v215_v13 }
 0x1ea   : > { %1365 = vrot.lane.b32.xlu0 %v2941_v47, %s2383_s23  ;;  %1542 = vrot.lane.b32.xlu1 %v2251_v12, %s2384_s24  ;;  %v2235_v47 = vld [vmem:[%s2420_s17 + $0x31] sm:$0xff] }
 0x1eb   : > { %1558 = vrot.lane.b32.xlu2 %v2259_v58, %s2384_s24  ;;  %v214_v58 = vld [vmem:[%s3727_s1 + $0x50] sm:$0xff] }
 0x1ec   : > { %v1138_v44 = vpop.permute.xlu0 %1137  ;;  %v1140_v14 = vpop.permute.xlu1 %1139  ;;  %2318 = vmatpush.msra.mxu2 %v214_v58  ;;  %2319 = vmatpush.msra.mxu3 %v214_v58 }
 0x1ed   : > { %1227 = vst.msk [vmem:[#allocation2 + $0x38] sm:$0xff] %vm1219_vm6, %v1138_v44  ;;  %v1160_v17 = vpop.permute.xlu2 %1159  ;;  %v2277_v44 = vld [vmem:[%s2420_s17 + $0xaa] sm:$0xff]  ;;  %1872 = vmatpush.msra.mxu0 %v214_v58  ;;  %2317 = vmatpush.msra.mxu1 %v214_v58 }
 0x1ee   : > { %1228 = vst.msk [vmem:[#allocation2 + $0x40] sm:$0xff] %vm1219_vm6, %v1140_v14  ;;  %v2254_v14 = vld [vmem:[%s2420_s17 + $0x111] sm:$0xff] }
 0x1ef   : > { %1238 = vst.msk [vmem:[#allocation2 + $0x90] sm:$0xff] %vm1219_vm6, %v1160_v17  ;;  %v2262_v17 = vld [vmem:[%s2420_s17 + $0x171] sm:$0xff] }
 0x1f2   : > { %1735 = vrot.lane.b32.xlu0 %v2283_v15, %s2385_s25  ;;  %1751 = vrot.lane.b32.xlu1 %v2291_v16, %s2385_s25  ;;  %v213_v16 = vld [vmem:[%s3727_s1 + $0x48] sm:$0xff] }
 0x1f3   : > { %1510 = vrot.lane.b32.xlu2 %v2235_v47, %s2384_s24  ;;  %v212_v47 = vld [vmem:[%s3727_s1 + $0x40] sm:$0xff]  ;;  %2321 = vmatpush.msra.mxu2 %v213_v16 }
 0x1f4   : > { %v1144_v18 = vpop.permute.xlu0 %1143  ;;  %v1146_v19 = vpop.permute.xlu1 %1145  ;;  %2322 = vmatpush.msra.mxu3 %v213_v16  ;;  %1873 = vmatpush.msra.mxu0 %v213_v16 }
 0x1f5   : > { %1230 = vst.msk [vmem:[#allocation2 + $0x50] sm:$0xff] %vm1219_vm6, %v1144_v18  ;;  %v1166_v22 = vpop.permute.xlu2 %1165  ;;  %2324 = vmatpush.msra.mxu2 %v212_v47  ;;  %2320 = vmatpush.msra.mxu1 %v213_v16  ;;  %v2272_v16 = vld [vmem:[%s2420_s17 + $0x6a] sm:$0xff] }
 0x1f6   : > { %1231 = vst.msk [vmem:[#allocation2 + $0x58] sm:$0xff] %vm1219_vm6, %v1146_v19  ;;  %2325 = vmatpush.msra.mxu3 %v212_v47  ;;  %1874 = vmatpush.msra.mxu0 %v212_v47 }
 0x1f7   : > { %1241 = vst.msk [vmem:[#allocation2 + $0xa8] sm:$0xff] %vm1219_vm6, %v1166_v22  ;;  %v2286_v22 = vld [vmem:[%s2420_s17 + $0x112] sm:$0xff]  ;;  %2323 = vmatpush.msra.mxu1 %v212_v47 }
 0x1fa   : > { %1526 = vrot.lane.b32.xlu0 %v2243_v20, %s2384_s24  ;;  %1351 = vrot.lane.b32.xlu1 %v2220_v21, %s2383_s23  ;;  %v211_v20 = vld [vmem:[%s3727_s1 + $0x38] sm:$0xff]  ;;  %v210_v21 = vld [vmem:[%s3727_s1 + $0x30] sm:$0xff] }
 0x1fb   : > { %1367 = vrot.lane.b32.xlu2 %v2948_v36, %s2383_s23  ;;  %v2260_v36 = vld [vmem:[%s2420_s17 + $0x159] sm:$0xff]  ;;  %2327 = vmatpush.msra.mxu2 %v211_v20 }
 0x1fc   : > { %v1150_v23 = vpop.permute.xlu0 %1149  ;;  %v1152_v24 = vpop.permute.xlu1 %1151  ;;  %2328 = vmatpush.msra.mxu3 %v211_v20  ;;  %1875 = vmatpush.msra.mxu0 %v211_v20 }
 0x1fd   : > { %1233 = vst.msk [vmem:[#allocation2 + $0x68] sm:$0xff] %vm1219_vm6, %v1150_v23  ;;  %v1172_v27 = vpop.permute.xlu2 %1171  ;;  %v2294_v23 = vld [vmem:[%s2420_s17 + $0x172] sm:$0xff]  ;;  %2330 = vmatpush.msra.mxu2 %v210_v21  ;;  %2326 = vmatpush.msra.mxu1 %v211_v20  ;;  %v2280_v20 = vld [vmem:[%s2420_s17 + $0xca] sm:$0xff] }
 0x1fe   : > { %1234 = vst.msk [vmem:[#allocation2 + $0x70] sm:$0xff] %vm1219_vm6, %v1152_v24  ;;  %2331 = vmatpush.msra.mxu3 %v210_v21  ;;  %1876 = vmatpush.msra.mxu0 %v210_v21 }
 0x1ff   : > { %1244 = vst.msk [vmem:[#allocation2 + $0xc0] sm:$0xff] %vm1219_vm6, %v1172_v27  ;;  %v208_v27 = vld [vmem:[%s3727_s1 + $0x20] sm:$0xff]  ;;  %2329 = vmatpush.msra.mxu1 %v210_v21 }
 0x200   : > { %v2257_v21 = vld [vmem:[%s2420_s17 + $0x139] sm:$0xff] }
 0x202   : > { %1703 = vrot.lane.b32.xlu0 %v2267_v25, %s2385_s25  ;;  %1719 = vrot.lane.b32.xlu1 %v2275_v26, %s2385_s25  ;;  %v209_v25 = vld [vmem:[%s3727_s1 + $0x28] sm:$0xff]  ;;  %v2238_v26 = vld [vmem:[%s2420_s17 + $0x51] sm:$0xff] }
 0x203   : > { %1544 = vrot.lane.b32.xlu2 %v2252_v59, %s2384_s24  ;;  %2333 = vmatpush.msra.mxu2 %v209_v25 }
 0x204   : > { %v1156_v29 = vpop.permute.xlu0 %1155  ;;  %v1158_v30 = vpop.permute.xlu1 %1157  ;;  %2334 = vmatpush.msra.mxu3 %v209_v25  ;;  %1877 = vmatpush.msra.mxu0 %v209_v25 }
 0x205   : > { %1236 = vst.msk [vmem:[#allocation2 + $0x80] sm:$0xff] %vm1219_vm6, %v1156_v29  ;;  %v1178_v61 = vpop.permute.xlu2 %1177  ;;  %2336 = vmatpush.msra.mxu2 %v208_v27  ;;  %2332 = vmatpush.msra.mxu1 %v209_v25 }
 0x206   : > { %1237 = vst.msk [vmem:[#allocation2 + $0x88] sm:$0xff] %vm1219_vm6, %v1158_v30  ;;  %v207_v30 = vld [vmem:[%s3727_s1 + $0x18] sm:$0xff]  ;;  %2337 = vmatpush.msra.mxu3 %v208_v27  ;;  %1878 = vmatpush.msra.mxu0 %v208_v27 }
 0x207   : > { %1247 = vst.msk [vmem:[#allocation2 + $0xd8] sm:$0xff] %vm1219_vm6, %v1178_v61  ;;  %v2223_v61 = vld [vmem:[%s2420_s17 + $0x120] sm:$0xff]  ;;  %2339 = vmatpush.msra.mxu2 %v207_v30  ;;  %2335 = vmatpush.msra.mxu1 %v208_v27 }
 0x208   : > { %2340 = vmatpush.msra.mxu3 %v207_v30  ;;  %1879 = vmatpush.msra.mxu0 %v207_v30  ;;  %v2289_v27 = vld [vmem:[%s2420_s17 + $0x13a] sm:$0xff] }
 0x209   : > { %2338 = vmatpush.msra.mxu1 %v207_v30  ;;  %v2241_v30 = vld [vmem:[%s2420_s17 + $0x79] sm:$0xff] }
 0x20a   : > { %1560 = vrot.lane.b32.xlu0 %v2260_v36, %s2384_s24  ;;  %1737 = vrot.lane.b32.xlu1 %v2284_v31, %s2385_s25  ;;  %v206_v36 = vld [vmem:[%s3727_s1 + $0x10] sm:$0xff] }
 0x20b   : > { %1753 = vrot.lane.b32.xlu2 %v2292_v52, %s2385_s25  ;;  %v2246_v31 = vld [vmem:[%s2420_s17 + $0xb1] sm:$0xff]  ;;  %2342 = vmatpush.msra.mxu2 %v206_v36 }
 0x20c   : > { %v1162_v39 = vpop.permute.xlu0 %1161  ;;  %v1164_v46 = vpop.permute.xlu1 %1163  ;;  %2343 = vmatpush.msra.mxu3 %v206_v36  ;;  %1880 = vmatpush.msra.mxu0 %v206_v36 }
 0x20d   : > { %1239 = vst.msk [vmem:[#allocation2 + $0x98] sm:$0xff] %vm1219_vm6, %v1162_v39  ;;  %v1184_v50 = vpop.permute.xlu2 %1183  ;;  %v205_v39 = vld [vmem:[%s3727_s1 + $0x8] sm:$0xff]  ;;  %2341 = vmatpush.msra.mxu1 %v206_v36 }
 0x20e   : > { %1240 = vst.msk [vmem:[#allocation2 + $0xa0] sm:$0xff] %vm1219_vm6, %v1164_v46  ;;  %v2231_v46 = vld [vmem:[%s2420_s17 + $0x180] sm:$0xff]  ;;  %2345 = vmatpush.msra.mxu2 %v205_v39  ;;  %2346 = vmatpush.msra.mxu3 %v205_v39 }
 0x20f   : > { %1250 = vst.msk [vmem:[#allocation2 + $0xf0] sm:$0xff] %vm1219_vm6, %v1184_v50  ;;  %1881 = vmatpush.msra.mxu0 %v205_v39  ;;  %2344 = vmatpush.msra.mxu1 %v205_v39  ;;  %v2226_v39 = vld [vmem:[%s2420_s17 + $0x140] sm:$0xff] }
 0x212   : > { %1512 = vrot.lane.b32.xlu0 %v2236_v32, %s2384_s24  ;;  %1528 = vrot.lane.b32.xlu1 %v2244_v45, %s2384_s24  ;;  %v204_v32 = vld [vmem:[%s3727_s1] sm:$0xff] }
 0x213   : > { %1353 = vrot.lane.b32.xlu2 %v2221_v42, %s2383_s23  ;;  %2348 = vmatpush.msra.mxu2 %v204_v32  ;;  %v2270_v42 = vld [vmem:[%s2420_s17 + $0x52] sm:$0xff] }
 0x214   : > { %v1168_v56 = vpop.permute.xlu0 %1167  ;;  %v1170_v34 = vpop.permute.xlu1 %1169  ;;  %2349 = vmatpush.msra.mxu3 %v204_v32  ;;  %1882 = vmatpush.msra.mxu0 %v204_v32 }
 0x215   : > { %1242 = vst.msk [vmem:[#allocation2 + $0xb0] sm:$0xff] %vm1219_vm6, %v1168_v56  ;;  %v1320_v41 = vpop.permute.xlu2 %1319  ;;  %v2278_v56 = vld [vmem:[%s2420_s17 + $0xb2] sm:$0xff]  ;;  %2347 = vmatpush.msra.mxu1 %v204_v32  ;;  %v2234_v32 = vld [vmem:[%s2420_s17 + $0x1a0] sm:$0xff] }
 0x216   : > { %1243 = vst.msk [vmem:[#allocation2 + $0xb8] sm:$0xff] %vm1219_vm6, %v1170_v34 }
 0x217   : > { %1415 = vst.msk [vmem:[#allocation2 + $0x8] sm:$0xff] %vm1413_vm7, %v1320_v41 }
 0x21a   : > { %1369 = vrot.lane.b32.xlu0 %v2955_v43, %s2383_s23  ;;  %1705 = vrot.lane.b32.xlu1 %v2268_v38, %s2385_s25  ;;  %v2285_v43 = vld [vmem:[%s2420_s17 + $0x10a] sm:$0xff]  ;;  %v2255_v38 = vld [vmem:[%s2420_s17 + $0x121] sm:$0xff] }
 0x21b   : > { %1721 = vrot.lane.b32.xlu2 %v2276_v54, %s2385_s25 }
 0x21c   : > { %v1174_v49 = vpop.permute.xlu0 %1173  ;;  %v1176_v37 = vpop.permute.xlu1 %1175 }
 0x21d   : > { %1245 = vst.msk [vmem:[#allocation2 + $0xc8] sm:$0xff] %vm1219_vm6, %v1174_v49  ;;  %v1326_v1 = vpop.permute.xlu2 %1325  ;;  %v2287_v49 = vld [vmem:[%s2420_s17 + $0x122] sm:$0xff] }
 0x21e   : > { %1246 = vst.msk [vmem:[#allocation2 + $0xd0] sm:$0xff] %vm1219_vm6, %v1176_v37 }
 0x21f   : > { %1418 = vst.msk [vmem:[#allocation2 + $0x20] sm:$0xff] %vm1413_vm7, %v1326_v1  ;;  %v2239_v1 = vld [vmem:[%s2420_s17 + $0x61] sm:$0xff] }
 0x222   : > { %1546 = vrot.lane.b32.xlu0 %v2253_v57, %s2384_s24  ;;  %1562 = vrot.lane.b32.xlu1 %v2261_v51, %s2384_s24 }
 0x223   : > { %1739 = vrot.lane.b32.xlu2 %v2285_v43, %s2385_s25  ;;  %v2247_v43 = vld [vmem:[%s2420_s17 + $0xc1] sm:$0xff] }
 0x224   : > { %v1180_v4 = vpop.permute.xlu0 %1179  ;;  %v1182_v2 = vpop.permute.xlu1 %1181 }
 0x225   : > { %1248 = vst.msk [vmem:[#allocation2 + $0xe0] sm:$0xff] %vm1219_vm6, %v1180_v4  ;;  %v1332_v5 = vpop.permute.xlu2 %1331 }
 0x226   : > { %1249 = vst.msk [vmem:[#allocation2 + $0xe8] sm:$0xff] %vm1219_vm6, %v1182_v2 }
 0x227   : > { %1421 = vst.msk [vmem:[#allocation2 + $0x38] sm:$0xff] %vm1413_vm7, %v1332_v5 }
 0x22a   : > { %1755 = vrot.lane.b32.xlu0 %v2293_v63, %s2385_s25  ;;  %1514 = vrot.lane.b32.xlu1 %v2237_v0, %s2384_s24  ;;  %v2271_v0 = vld [vmem:[%s2420_s17 + $0x62] sm:$0xff] }
 0x22b   : > { %1530 = vrot.lane.b32.xlu2 %v2245_v6, %s2384_s24  ;;  %v2279_v6 = vld [vmem:[%s2420_s17 + $0xc2] sm:$0xff] }
 0x22c   : > { %v1186_v35 = vpop.permute.xlu0 %1185  ;;  %v1318_v40 = vpop.permute.xlu1 %1317 }
 0x22d   : > { %1251 = vst.msk [vmem:[#allocation2 + $0xf8] sm:$0xff] %vm1219_vm6, %v1186_v35  ;;  %v1338_v9 = vpop.permute.xlu2 %1337 }
 0x22e   : > { %1414 = vst.msk [vmem:[#allocation2] sm:$0xff] %vm1413_vm7, %v1318_v40 }
 0x22f   : > { %1424 = vst.msk [vmem:[#allocation2 + $0x50] sm:$0xff] %vm1413_vm7, %v1338_v9  ;;  %v2288_v9 = vld [vmem:[%s2420_s17 + $0x12a] sm:$0xff] }
 0x232   : > { %1355 = vrot.lane.b32.xlu0 %v2222_v33, %s2383_s23  ;;  %1371 = vrot.lane.b32.xlu1 %v2230_v48, %s2383_s23  ;;  %v2256_v33 = vld [vmem:[%s2420_s17 + $0x129] sm:$0xff] }
 0x233   : > { %1707 = vrot.lane.b32.xlu2 %v2269_v60, %s2385_s25 }
 0x234   : > { %v1322_v11 = vpop.permute.xlu0 %1321  ;;  %v1324_v12 = vpop.permute.xlu1 %1323 }
 0x235   : > { %1416 = vst.msk [vmem:[#allocation2 + $0x10] sm:$0xff] %vm1413_vm7, %v1322_v11  ;;  %v1344_v15 = vpop.permute.xlu2 %1343 }
 0x236   : > { %1417 = vst.msk [vmem:[#allocation2 + $0x18] sm:$0xff] %vm1413_vm7, %v1324_v12  ;;  %v2248_v12 = vld [vmem:[%s2420_s17 + $0xc9] sm:$0xff] }
 0x237   : > { %1427 = vst.msk [vmem:[#allocation2 + $0x68] sm:$0xff] %vm1413_vm7, %v1344_v15 }
 0x23a   : > { %1723 = vrot.lane.b32.xlu0 %v2277_v44, %s2385_s25  ;;  %1548 = vrot.lane.b32.xlu1 %v2254_v14, %s2384_s24  ;;  %v2225_v14 = vld [vmem:[%s2420_s17 + $0x138] sm:$0xff] }
 0x23b   : > { %1564 = vrot.lane.b32.xlu2 %v2262_v17, %s2384_s24 }
 0x23c   : > { %v1328_v18 = vpop.permute.xlu0 %1327  ;;  %v1330_v19 = vpop.permute.xlu1 %1329 }
 0x23d   : > { %1419 = vst.msk [vmem:[#allocation2 + $0x28] sm:$0xff] %vm1413_vm7, %v1328_v18  ;;  %v1350_v24 = vpop.permute.xlu2 %1349 }
 0x23e   : > { %1420 = vst.msk [vmem:[#allocation2 + $0x30] sm:$0xff] %vm1413_vm7, %v1330_v19 }
 0x23f   : > { %1430 = vst.msk [vmem:[#allocation2 + $0x80] sm:$0xff] %vm1413_vm7, %v1350_v24 }
 0x242   : > { %1741 = vrot.lane.b32.xlu0 %v2286_v22, %s2385_s25  ;;  %1757 = vrot.lane.b32.xlu1 %v2294_v23, %s2385_s25  ;;  %v2265_v23 = vld [vmem:[%s2420_s17 + $0x199] sm:$0xff] }
 0x243   : > { %1516 = vrot.lane.b32.xlu2 %v2238_v26, %s2384_s24 }
 0x244   : > { %v1334_v59 = vpop.permute.xlu0 %1333  ;;  %v1336_v29 = vpop.permute.xlu1 %1335 }
 0x245   : > { %1422 = vst.msk [vmem:[#allocation2 + $0x40] sm:$0xff] %vm1413_vm7, %v1334_v59  ;;  %v1559_v52 = vpop.permute.xlu2 %1558  ;;  %v2297_v59 = vld [vmem:[%s2420_s17 + $0x19a] sm:$0xff] }
 0x246   : > { %1423 = vst.msk [vmem:[#allocation2 + $0x48] sm:$0xff] %vm1413_vm7, %v1336_v29 }
 0x24a   : > { %1532 = vrot.lane.b32.xlu0 %v2246_v31, %s2384_s24  ;;  %1357 = vrot.lane.b32.xlu1 %v2223_v61, %s2383_s23 }
 0x24b   : > { %1373 = vrot.lane.b32.xlu2 %v2231_v46, %s2383_s23 }
 0x24c   : > { %v1340_v45 = vpop.permute.xlu0 %1339  ;;  %v1342_v50 = vpop.permute.xlu1 %1341 }
 0x24d   : > { %1425 = vst.msk [vmem:[#allocation2 + $0x58] sm:$0xff] %vm1413_vm7, %v1340_v45  ;;  %v1511_v34 = vpop.permute.xlu2 %1510 }
 0x24e   : > { %1426 = vst.msk [vmem:[#allocation2 + $0x60] sm:$0xff] %vm1413_vm7, %v1342_v50 }
 0x24f   : > { %1607 = vst.msk [vmem:[#allocation2] sm:$0xff] %vm1606_vm8, %v1511_v34  ;;  %v2281_v34 = vld [vmem:[%s2420_s17 + $0xda] sm:$0xff] }
 0x252   : > { %1709 = vrot.lane.b32.xlu0 %v2270_v42, %s2385_s25  ;;  %1725 = vrot.lane.b32.xlu1 %v2278_v56, %s2385_s25  ;;  %v2273_v56 = vld [vmem:[%s2420_s17 + $0x7a] sm:$0xff] }
 0x253   : > { %1550 = vrot.lane.b32.xlu2 %v2255_v38, %s2384_s24 }
 0x254   : > { %v1346_v41 = vpop.permute.xlu0 %1345  ;;  %v1348_v54 = vpop.permute.xlu1 %1347 }
 0x255   : > { %1428 = vst.msk [vmem:[#allocation2 + $0x70] sm:$0xff] %vm1413_vm7, %v1346_v41  ;;  %v1368_v37 = vpop.permute.xlu2 %1367  ;;  %v2258_v41 = vld [vmem:[%s2420_s17 + $0x141] sm:$0xff] }
 0x256   : > { %1429 = vst.msk [vmem:[#allocation2 + $0x78] sm:$0xff] %vm1413_vm7, %v1348_v54 }
 0x257   : > { %1439 = vst.msk [vmem:[#allocation2 + $0xc8] sm:$0xff] %vm1413_vm7, %v1368_v37 }
 0x25a   : > { %1566 = vrot.lane.b32.xlu0 %v3159_v28, %s2384_s24  ;;  %1743 = vrot.lane.b32.xlu1 %v2287_v49, %s2385_s25  ;;  %v2224_v28 = vld [vmem:[%s2420_s17 + $0x128] sm:$0xff] }
 0x25b   : > { %1759 = vrot.lane.b32.xlu2 %v3260_v55, %s2385_s25  ;;  %v2232_v55 = vld [vmem:[%s2420_s17 + $0x188] sm:$0xff] }
 0x25c   : > { %v1366_v57 = vpop.permute.xlu0 %1365  ;;  %v1543_v51 = vpop.permute.xlu1 %1542 }
 0x25d   : > { %1438 = vst.msk [vmem:[#allocation2 + $0xc0] sm:$0xff] %vm1413_vm7, %v1366_v57  ;;  %v1545_v4 = vpop.permute.xlu2 %1544 }
 0x25e   : > { %1623 = vst.msk [vmem:[#allocation2 + $0x80] sm:$0xff] %vm1606_vm8, %v1543_v51  ;;  %v2266_v51 = vld [vmem:[%s2420_s17 + $0x1a1] sm:$0xff] }
 0x25f   : > { %1631 = vst.msk [vmem:[#allocation2 + $0xc0] sm:$0xff] %vm1606_vm8, %v1559_v52  ;;  %v2249_v52 = vld [vmem:[%s2420_s17 + $0xd9] sm:$0xff] }
 0x262   : > { %1518 = vrot.lane.b32.xlu0 %v2239_v1, %s2384_s24  ;;  %1534 = vrot.lane.b32.xlu1 %v2247_v43, %s2384_s24  ;;  %v2290_v1 = vld [vmem:[%s2420_s17 + $0x142] sm:$0xff] }
 0x263   : > { %1359 = vrot.lane.b32.xlu2 %v2224_v28, %s2383_s23 }
 0x264   : > { %v1736_v2 = vpop.permute.xlu0 %1735  ;;  %v1752_v63 = vpop.permute.xlu1 %1751 }
 0x265   : > { %1816 = vst.msk [vmem:[#allocation2 + $0x80] sm:$0xff] %vm1799_vm9, %v1736_v2  ;;  %v1754_v5 = vpop.permute.xlu2 %1753 }
 0x266   : > { %1824 = vst.msk [vmem:[#allocation2 + $0xc0] sm:$0xff] %vm1799_vm9, %v1752_v63  ;;  %v2242_v63 = vld [vmem:[%s2420_s17 + $0x81] sm:$0xff] }
 0x26a   : > { %1375 = vrot.lane.b32.xlu0 %v2232_v55, %s2383_s23  ;;  %1711 = vrot.lane.b32.xlu1 %v2271_v0, %s2385_s25  ;;  %v2250_v55 = vld [vmem:[%s2420_s17 + $0xe1] sm:$0xff] }
 0x26b   : > { %1727 = vrot.lane.b32.xlu2 %v2279_v6, %s2385_s25 }
 0x26c   : > { %v1527_v35 = vpop.permute.xlu0 %1526  ;;  %v1848_v40 = vld [vmem:[#allocation2 + $0x80] sm:$0xff]  ;;  %v1352_v7 = vpop.permute.xlu1 %1351 }
 0x26d   : > { %1615 = vst.msk [vmem:[#allocation2 + $0x40] sm:$0xff] %vm1606_vm8, %v1527_v35  ;;  %1931 = vmatmul.f32.vlgmr.msra.gmra.mxu2 %v1848_v40  ;;  %v1856_v8 = vld [vmem:[#allocation2 + $0xc0] sm:$0xff]  ;;  %v1354_v48 = vpop.permute.xlu2 %1353 }
 0x26e   : > { %1431 = vst.msk [vmem:[#allocation2 + $0x88] sm:$0xff] %vm1413_vm7, %v1352_v7  ;;  %1955 = vmatmul.f32.vlgmr.msra.gmra.mxu3 %v1856_v8  ;;  %v2282_v7 = vld [vmem:[%s2420_s17 + $0xe2] sm:$0xff] }
 0x26f   : > { %1624 = vst.msk [vmem:[#allocation2 + $0x88] sm:$0xff] %vm1606_vm8, %v1545_v4  ;;  %v2298_v4 = vld [vmem:[%s2420_s17 + $0x1a2] sm:$0xff] }
 0x270   : > { %1432 = vst.msk [vmem:[#allocation2 + $0x90] sm:$0xff] %vm1413_vm7, %v1354_v48 }
 0x272   : > { %1552 = vrot.lane.b32.xlu0 %v2256_v33, %s2384_s24  ;;  %1568 = vrot.lane.b32.xlu1 %v3162_v53, %s2384_s24 }
 0x273   : > { %1745 = vrot.lane.b32.xlu2 %v2288_v9, %s2385_s25 }
 0x274   : > { %v1704_v10 = vpop.permute.xlu0 %1703  ;;  %v1720_v60 = vpop.permute.xlu1 %1719 }
 0x275   : > { %1800 = vst.msk [vmem:[#allocation2] sm:$0xff] %vm1799_vm9, %v1704_v10  ;;  %v1722_v11 = vpop.permute.xlu2 %1721 }
 0x276   : > { %1808 = vst.msk [vmem:[#allocation2 + $0x40] sm:$0xff] %vm1799_vm9, %v1720_v60 }
 0x27a   : > { %1761 = vrot.lane.b32.xlu0 %v3267_v3, %s2385_s25  ;;  %1520 = vrot.lane.b32.xlu1 %v2240_v62, %s2384_s24  ;;  %v2233_v3 = vld [vmem:[%s2420_s17 + $0x198] sm:$0xff] }
 0x27b   : > { %1536 = vrot.lane.b32.xlu2 %v2248_v12, %s2384_s24 }
 0x27c   : > { %v1561_v53 = vpop.permute.xlu0 %1560  ;;  %v1832_v13 = vld [vmem:[#allocation2] sm:$0xff]  ;;  %v1738_v58 = vpop.permute.xlu1 %1737 }
 0x27d   : > { %1632 = vst.msk [vmem:[#allocation2 + $0xc8] sm:$0xff] %vm1606_vm8, %v1561_v53  ;;  %1883 = vmatmul.f32.vlgmr.msra.gmra.mxu0 %v1832_v13  ;;  %v1840_v44 = vld [vmem:[#allocation2 + $0x40] sm:$0xff]  ;;  %v1740_v15 = vpop.permute.xlu2 %1739 }
 0x27e   : > { %1817 = vst.msk [vmem:[#allocation2 + $0x88] sm:$0xff] %vm1799_vm9, %v1738_v58  ;;  %1907 = vmatmul.f32.vlgmr.msra.gmra.mxu1 %v1840_v44 }
 0x27f   : > { %1825 = vst.msk [vmem:[#allocation2 + $0xc8] sm:$0xff] %vm1799_vm9, %v1754_v5  ;;  %v2274_v5 = vld [vmem:[%s2420_s17 + $0x82] sm:$0xff] }
 0x282   : > { %1361 = vrot.lane.b32.xlu0 %v2225_v14, %s2383_s23  ;;  %1377 = vrot.lane.b32.xlu1 %v2233_v3, %s2383_s23 }
 0x283   : > { %1713 = vrot.lane.b32.xlu2 %v2272_v16, %s2385_s25 }
 0x284   : > { %v1513_v17 = vpop.permute.xlu0 %1512  ;;  %v1529_v47 = vpop.permute.xlu1 %1528 }
 0x285   : > { %1608 = vst.msk [vmem:[#allocation2 + $0x8] sm:$0xff] %vm1606_vm8, %v1513_v17  ;;  %v1849_v18 = vld [vmem:[#allocation2 + $0x88] sm:$0xff]  ;;  %v1531_v22 = vpop.permute.xlu2 %1530 }
 0x286   : > { %1616 = vst.msk [vmem:[#allocation2 + $0x48] sm:$0xff] %vm1606_vm8, %v1529_v47  ;;  %1934 = vmatmul.f32.gmra.mxu2 %v1849_v18  ;;  %v1857_v19 = vld [vmem:[#allocation2 + $0xc8] sm:$0xff] }
 0x287   : > { %1958 = vmatmul.f32.gmra.mxu3 %v1857_v19  ;;  %1809 = vst.msk [vmem:[#allocation2 + $0x48] sm:$0xff] %vm1799_vm9, %v1722_v11 }
 0x288   : > { %1617 = vst.msk [vmem:[#allocation2 + $0x50] sm:$0xff] %vm1606_vm8, %v1531_v22 }
 0x28a   : > { %1729 = vrot.lane.b32.xlu0 %v2280_v20, %s2385_s25  ;;  %1554 = vrot.lane.b32.xlu1 %v2257_v21, %s2384_s24 }
 0x28b   : > { %1570 = vrot.lane.b32.xlu2 %v2265_v23, %s2384_s24 }
 0x28c   : > { %v1370_v24 = vpop.permute.xlu0 %1369  ;;  %v1706_v25 = vpop.permute.xlu1 %1705 }
 0x28d   : > { %1440 = vst.msk [vmem:[#allocation2 + $0xd0] sm:$0xff] %vm1413_vm7, %v1370_v24  ;;  %v1708_v29 = vpop.permute.xlu2 %1707 }
 0x28e   : > { %1801 = vst.msk [vmem:[#allocation2 + $0x8] sm:$0xff] %vm1799_vm9, %v1706_v25  ;;  %v1841_v26 = vld [vmem:[#allocation2 + $0x48] sm:$0xff] }
 0x28f   : > { %1910 = vmatmul.f32.gmra.mxu1 %v1841_v26 }
 0x292   : > { %1747 = vrot.lane.b32.xlu0 %v2289_v27, %s2385_s25  ;;  %1763 = vrot.lane.b32.xlu1 %v2297_v59, %s2385_s25  ;;  %v3628_v59 = vld [vmem:[%s3728_s2] ss:$0 sm:$0xff] }
 0x293   : > { %1522 = vrot.lane.b32.xlu2 %v2241_v30, %s2384_s24 }
 0x294   : > { %v1547_v36 = vpop.permute.xlu0 %1546  ;;  %v1563_v31 = vpop.permute.xlu1 %1562 }
 0x295   : > { %1625 = vst.msk [vmem:[#allocation2 + $0x90] sm:$0xff] %vm1606_vm8, %v1547_v36  ;;  %v1833_v61 = vld [vmem:[#allocation2 + $0x8] sm:$0xff]  ;;  %v1565_v46 = vpop.permute.xlu2 %1564 }
 0x296   : > { %1633 = vst.msk [vmem:[#allocation2 + $0xd0] sm:$0xff] %vm1606_vm8, %v1563_v31  ;;  %1886 = vmatmul.f32.gmra.mxu0 %v1833_v61 }
 0x297   : > { %1818 = vst.msk [vmem:[#allocation2 + $0x90] sm:$0xff] %vm1799_vm9, %v1740_v15 }
 0x29a   : > { %1538 = vrot.lane.b32.xlu0 %v2249_v52, %s2384_s24  ;;  %1363 = vrot.lane.b32.xlu1 %v2226_v39, %s2383_s23 }
 0x29b   : > { %1379 = vrot.lane.b32.xlu2 %v2234_v32, %s2383_s23 }
 0x29c   : > { %v1756_v45 = vpop.permute.xlu0 %1755  ;;  %v1515_v50 = vpop.permute.xlu1 %1514 }
 0x29d   : > { %1826 = vst.msk [vmem:[#allocation2 + $0xd0] sm:$0xff] %vm1799_vm9, %v1756_v45  ;;  %v1517_v38 = vpop.permute.xlu2 %1516 }
 0x29e   : > { %1609 = vst.msk [vmem:[#allocation2 + $0x10] sm:$0xff] %vm1606_vm8, %v1515_v50  ;;  %v1850_v42 = vld [vmem:[#allocation2 + $0x90] sm:$0xff] }
 0x29f   : > { %1937 = vmatmul.f32.gmra.mxu2 %v1850_v42  ;;  %1802 = vst.msk [vmem:[#allocation2 + $0x10] sm:$0xff] %vm1799_vm9, %v1708_v29 }
 0x2a0   : > { %1610 = vst.msk [vmem:[#allocation2 + $0x18] sm:$0xff] %vm1606_vm8, %v1517_v38 }
 0x2a2   : > { %1715 = vrot.lane.b32.xlu0 %v2273_v56, %s2385_s25  ;;  %1731 = vrot.lane.b32.xlu1 %v2281_v34, %s2385_s25 }
 0x2a3   : > { %1556 = vrot.lane.b32.xlu2 %v2258_v41, %s2384_s24 }
 0x2a4   : > { %v1356_v54 = vpop.permute.xlu0 %1355  ;;  %v1858_v49 = vld [vmem:[#allocation2 + $0xd0] sm:$0xff]  ;;  %v1372_v37 = vpop.permute.xlu1 %1371 }
 0x2a5   : > { %1433 = vst.msk [vmem:[#allocation2 + $0x98] sm:$0xff] %vm1413_vm7, %v1356_v54  ;;  %1961 = vmatmul.f32.gmra.mxu3 %v1858_v49  ;;  %v1374_v43 = vpop.permute.xlu2 %1373 }
 0x2a6   : > { %1441 = vst.msk [vmem:[#allocation2 + $0xd8] sm:$0xff] %vm1413_vm7, %v1372_v37  ;;  %v1834_v57 = vld [vmem:[#allocation2 + $0x10] sm:$0xff] }
 0x2a7   : > { %1634 = vst.msk [vmem:[#allocation2 + $0xd8] sm:$0xff] %vm1606_vm8, %v1565_v46  ;;  %1889 = vmatmul.f32.gmra.mxu0 %v1834_v57 }
 0x2a8   : > { %1442 = vst.msk [vmem:[#allocation2 + $0xe0] sm:$0xff] %vm1413_vm7, %v1374_v43 }
 0x2aa   : > { %1572 = vrot.lane.b32.xlu0 %v2266_v51, %s2384_s24  ;;  %1749 = vrot.lane.b32.xlu1 %v2290_v1, %s2385_s25 }
 0x2ab   : > { %1765 = vrot.lane.b32.xlu2 %v2298_v4, %s2385_s25 }
 0x2ac   : > { %v1724_v28 = vpop.permute.xlu0 %1723  ;;  %v1549_v2 = vpop.permute.xlu1 %1548 }
 0x2ad   : > { %1810 = vst.msk [vmem:[#allocation2 + $0x50] sm:$0xff] %vm1799_vm9, %v1724_v28  ;;  %v1551_v0 = vpop.permute.xlu2 %1550 }
 0x2ae   : > { %1626 = vst.msk [vmem:[#allocation2 + $0x98] sm:$0xff] %vm1606_vm8, %v1549_v2 }
 0x2b2   : > { %1524 = vrot.lane.b32.xlu0 %v2242_v63, %s2384_s24  ;;  %1540 = vrot.lane.b32.xlu1 %v2250_v55, %s2384_s24  ;;  %s2301_s24 = sshll.u32 %s3821_s13, 8 }
 0x2b3   : > { %1717 = vrot.lane.b32.xlu2 %v2274_v5, %s2385_s25  ;;  %s3638_s11 = scalar_lea.vmem %s3729_s3, %s2301_s24 }
 0x2b4   : > { %v1742_v6 = vpop.permute.xlu0 %1741  ;;  %v1842_v35 = vld [vmem:[#allocation2 + $0x50] sm:$0xff]  ;;  %v1758_v40 = vpop.permute.xlu1 %1757 }
 0x2b5   : > { %1819 = vst.msk [vmem:[#allocation2 + $0x98] sm:$0xff] %vm1799_vm9, %v1742_v6  ;;  %1913 = vmatmul.f32.gmra.mxu1 %v1842_v35  ;;  %v1760_v8 = vpop.permute.xlu2 %1759 }
 0x2b6   : > { %1827 = vst.msk [vmem:[#allocation2 + $0xd8] sm:$0xff] %vm1799_vm9, %v1758_v40 }
 0x2ba   : > { %1733 = vrot.lane.b32.xlu0 %v2282_v7, %s2385_s25 }
 0x2bc   : > { %v1533_v33 = vpop.permute.xlu0 %1532  ;;  %v1851_v48 = vld [vmem:[#allocation2 + $0x98] sm:$0xff]  ;;  %v1358_v9 = vpop.permute.xlu1 %1357 }
 0x2bd   : > { %1618 = vst.msk [vmem:[#allocation2 + $0x58] sm:$0xff] %vm1606_vm8, %v1533_v33  ;;  %1940 = vmatmul.f32.gmra.mxu2 %v1851_v48  ;;  %v1859_v10 = vld [vmem:[#allocation2 + $0xd8] sm:$0xff]  ;;  %v1360_v60 = vpop.permute.xlu2 %1359 }
 0x2be   : > { %1434 = vst.msk [vmem:[#allocation2 + $0xa0] sm:$0xff] %vm1413_vm7, %v1358_v9  ;;  %1964 = vmatmul.f32.gmra.mxu3 %v1859_v10 }
 0x2bf   : > { %1627 = vst.msk [vmem:[#allocation2 + $0xa0] sm:$0xff] %vm1606_vm8, %v1551_v0 }
 0x2c0   : > { %1435 = vst.msk [vmem:[#allocation2 + $0xa8] sm:$0xff] %vm1413_vm7, %v1360_v60 }
 0x2c4   : > { %v1710_v62 = vpop.permute.xlu0 %1709  ;;  %v1726_v11 = vpop.permute.xlu1 %1725 }
 0x2c5   : > { %1803 = vst.msk [vmem:[#allocation2 + $0x18] sm:$0xff] %vm1799_vm9, %v1710_v62  ;;  %v1728_v12 = vpop.permute.xlu2 %1727 }
 0x2c6   : > { %1811 = vst.msk [vmem:[#allocation2 + $0x58] sm:$0xff] %vm1799_vm9, %v1726_v11 }
 0x2cc   : > { %v1567_v53 = vpop.permute.xlu0 %1566  ;;  %v1835_v13 = vld [vmem:[#allocation2 + $0x18] sm:$0xff]  ;;  %v1744_v58 = vpop.permute.xlu1 %1743 }
 0x2cd   : > { %1635 = vst.msk [vmem:[#allocation2 + $0xe0] sm:$0xff] %vm1606_vm8, %v1567_v53  ;;  %1892 = vmatmul.f32.gmra.mxu0 %v1835_v13  ;;  %v1843_v44 = vld [vmem:[#allocation2 + $0x58] sm:$0xff]  ;;  %v1746_v14 = vpop.permute.xlu2 %1745 }
 0x2ce   : > { %1820 = vst.msk [vmem:[#allocation2 + $0xa0] sm:$0xff] %vm1799_vm9, %v1744_v58  ;;  %1916 = vmatmul.f32.gmra.mxu1 %v1843_v44 }
 0x2cf   : > { %1828 = vst.msk [vmem:[#allocation2 + $0xe0] sm:$0xff] %vm1799_vm9, %v1760_v8 }
 0x2d4   : > { %v1519_v3 = vpop.permute.xlu0 %1518  ;;  %v1535_v15 = vpop.permute.xlu1 %1534 }
 0x2d5   : > { %1611 = vst.msk [vmem:[#allocation2 + $0x20] sm:$0xff] %vm1606_vm8, %v1519_v3  ;;  %v1852_v16 = vld [vmem:[#allocation2 + $0xa0] sm:$0xff]  ;;  %v1537_v47 = vpop.permute.xlu2 %1536 }
 0x2d6   : > { %1619 = vst.msk [vmem:[#allocation2 + $0x60] sm:$0xff] %vm1606_vm8, %v1535_v15  ;;  %1943 = vmatmul.f32.gmra.mxu2 %v1852_v16  ;;  %v1860_v17 = vld [vmem:[#allocation2 + $0xe0] sm:$0xff] }
 0x2d7   : > { %1967 = vmatmul.f32.gmra.mxu3 %v1860_v17  ;;  %1812 = vst.msk [vmem:[#allocation2 + $0x60] sm:$0xff] %vm1799_vm9, %v1728_v12 }
 0x2d8   : > { %1620 = vst.msk [vmem:[#allocation2 + $0x68] sm:$0xff] %vm1606_vm8, %v1537_v47 }
 0x2dc   : > { %v1376_v18 = vpop.permute.xlu0 %1375  ;;  %v1712_v19 = vpop.permute.xlu1 %1711 }
 0x2dd   : > { %1443 = vst.msk [vmem:[#allocation2 + $0xe8] sm:$0xff] %vm1413_vm7, %v1376_v18  ;;  %v1714_v21 = vpop.permute.xlu2 %1713 }
 0x2de   : > { %1804 = vst.msk [vmem:[#allocation2 + $0x20] sm:$0xff] %vm1799_vm9, %v1712_v19  ;;  %v1844_v20 = vld [vmem:[#allocation2 + $0x60] sm:$0xff] }
 0x2df   : > { %1919 = vmatmul.f32.gmra.mxu1 %v1844_v20 }
 0x2e4   : > { %v1553_v22 = vpop.permute.xlu0 %1552  ;;  %v1569_v23 = vpop.permute.xlu1 %1568 }
 0x2e5   : > { %1628 = vst.msk [vmem:[#allocation2 + $0xa8] sm:$0xff] %vm1606_vm8, %v1553_v22  ;;  %v1836_v24 = vld [vmem:[#allocation2 + $0x20] sm:$0xff]  ;;  %v1571_v25 = vpop.permute.xlu2 %1570 }
 0x2e6   : > { %1636 = vst.msk [vmem:[#allocation2 + $0xe8] sm:$0xff] %vm1606_vm8, %v1569_v23  ;;  %1895 = vmatmul.f32.gmra.mxu0 %v1836_v24 }
 0x2e7   : > { %1821 = vst.msk [vmem:[#allocation2 + $0xa8] sm:$0xff] %vm1799_vm9, %v1746_v14 }
 0x2ec   : > { %v1762_v26 = vpop.permute.xlu0 %1761  ;;  %v1521_v27 = vpop.permute.xlu1 %1520 }
 0x2ed   : > { %1829 = vst.msk [vmem:[#allocation2 + $0xe8] sm:$0xff] %vm1799_vm9, %v1762_v26  ;;  %v1523_v30 = vpop.permute.xlu2 %1522 }
 0x2ee   : > { %1612 = vst.msk [vmem:[#allocation2 + $0x28] sm:$0xff] %vm1606_vm8, %v1521_v27  ;;  %v1853_v29 = vld [vmem:[#allocation2 + $0xa8] sm:$0xff] }
 0x2ef   : > { %1946 = vmatmul.f32.gmra.mxu2 %v1853_v29  ;;  %1805 = vst.msk [vmem:[#allocation2 + $0x28] sm:$0xff] %vm1799_vm9, %v1714_v21 }
 0x2f0   : > { %v1932_v36 = vpop.f32.mrf.mxu2  ;;  %1613 = vst.msk [vmem:[#allocation2 + $0x30] sm:$0xff] %vm1606_vm8, %v1523_v30 }
 0x2f1   : > { %v1933_v31 = vadd.f32 %v3628_v59, %v1932_v36  ;;  %v1956_v61 = vpop.f32.mrf.mxu3 }
 0x2f2   : > { %v1957_v52 = vadd.f32 %v3628_v59, %v1956_v61 }
 0x2f3   : > { %v1996_v39 = vmax.f32 %v1933_v31, 0.0 }
 0x2f4   : > { %v1362_v46 = vpop.permute.xlu0 %1361  ;;  %v1861_v32 = vld [vmem:[#allocation2 + $0xe8] sm:$0xff]  ;;  %v2004_v45 = vmax.f32 %v1957_v52, 0.0  ;;  %v1378_v50 = vpop.permute.xlu1 %1377 }
 0x2f5   : > { %2028 = vst [vmem:[%s3638_s11 + $0x80] sm:$0xff] %v1996_v39  ;;  %1970 = vmatmul.f32.gmra.mxu3 %v1861_v32  ;;  %v1380_v56 = vpop.permute.xlu2 %1379 }
 0x2f6   : > { %1436 = vst.msk [vmem:[#allocation2 + $0xb0] sm:$0xff] %vm1413_vm7, %v1362_v46  ;;  %v1837_v42 = vld [vmem:[#allocation2 + $0x28] sm:$0xff] }
 0x2f7   : > { %2036 = vst [vmem:[%s3638_s11 + $0xc0] sm:$0xff] %v2004_v45  ;;  %1898 = vmatmul.f32.gmra.mxu0 %v1837_v42 }
 0x2f8   : > { %1444 = vst.msk [vmem:[#allocation2 + $0xf0] sm:$0xff] %vm1413_vm7, %v1378_v50 }
 0x2f9   : > { %1637 = vst.msk [vmem:[#allocation2 + $0xf0] sm:$0xff] %vm1606_vm8, %v1571_v25 }
 0x2fa   : > { %v1884_v34 = vpop.f32.mrf.mxu0  ;;  %1445 = vst.msk [vmem:[#allocation2 + $0xf8] sm:$0xff] %vm1413_vm7, %v1380_v56 }
 0x2fb   : > { %v1885_v38 = vadd.f32 %v3628_v59, %v1884_v34  ;;  %v1908_v41 = vpop.f32.mrf.mxu1 }
 0x2fc   : > { %v1730_v54 = vpop.permute.xlu0 %1729  ;;  %v1909_v49 = vadd.f32 %v3628_v59, %v1908_v41  ;;  %v1555_v37 = vpop.permute.xlu1 %1554 }
 0x2fd   : > { %v1980_v57 = vmax.f32 %v1885_v38, 0.0  ;;  %1813 = vst.msk [vmem:[#allocation2 + $0x68] sm:$0xff] %vm1799_vm9, %v1730_v54  ;;  %v1557_v48 = vpop.permute.xlu2 %1556 }
 0x2fe   : > { %v1988_v51 = vmax.f32 %v1909_v49, 0.0  ;;  %1629 = vst.msk [vmem:[#allocation2 + $0xb0] sm:$0xff] %vm1606_vm8, %v1555_v37 }
 0x2ff   : > { %2012 = vst [vmem:[%s3638_s11] sm:$0xff] %v1980_v57 }
 0x300   : > { %2020 = vst [vmem:[%s3638_s11 + $0x40] sm:$0xff] %v1988_v51 }
 0x304   : > { %v1748_v1 = vpop.permute.xlu0 %1747  ;;  %v1845_v43 = vld [vmem:[#allocation2 + $0x68] sm:$0xff]  ;;  %v1764_v4 = vpop.permute.xlu1 %1763 }
 0x305   : > { %1822 = vst.msk [vmem:[#allocation2 + $0xb0] sm:$0xff] %vm1799_vm9, %v1748_v1  ;;  %1922 = vmatmul.f32.gmra.mxu1 %v1845_v43  ;;  %v1766_v53 = vpop.permute.xlu2 %1765 }
 0x306   : > { %1830 = vst.msk [vmem:[#allocation2 + $0xf0] sm:$0xff] %vm1799_vm9, %v1764_v4 }
 0x309   : > { %v1935_v28 = vpop.f32.mrf.mxu2 }
 0x30a   : > { %v1936_v2 = vadd.f32 %v3628_v59, %v1935_v28  ;;  %v1959_v63 = vpop.f32.mrf.mxu3 }
 0x30b   : > { %v1960_v55 = vadd.f32 %v3628_v59, %v1959_v63 }
 0x30c   : > { %v1539_v0 = vpop.permute.xlu0 %1538  ;;  %v1854_v5 = vld [vmem:[#allocation2 + $0xb0] sm:$0xff]  ;;  %v1997_v6 = vmax.f32 %v1936_v2, 0.0  ;;  %v1364_v35 = vpop.permute.xlu1 %1363 }
 0x30d   : > { %1621 = vst.msk [vmem:[#allocation2 + $0x70] sm:$0xff] %vm1606_vm8, %v1539_v0  ;;  %1949 = vmatmul.f32.gmra.mxu2 %v1854_v5  ;;  %v2005_v40 = vmax.f32 %v1960_v55, 0.0  ;;  %v1862_v7 = vld [vmem:[#allocation2 + $0xf0] sm:$0xff]  ;;  %v1911_v8 = vpop.f32.mrf.mxu1  ;;  %v1718_v18 = vpop.permute.xlu2 %1717 }
 0x30e   : > { %2029 = vst [vmem:[%s3638_s11 + $0x88] sm:$0xff] %v1997_v6  ;;  %1973 = vmatmul.f32.gmra.mxu3 %v1862_v7  ;;  %v1912_v33 = vadd.f32 %v3628_v59, %v1911_v8 }
 0x30f   : > { %2037 = vst [vmem:[%s3638_s11 + $0xc8] sm:$0xff] %v2005_v40 }
 0x310   : > { %1437 = vst.msk [vmem:[#allocation2 + $0xb8] sm:$0xff] %vm1413_vm7, %v1364_v35  ;;  %v1989_v9 = vmax.f32 %v1912_v33, 0.0 }
 0x311   : > { %1630 = vst.msk [vmem:[#allocation2 + $0xb8] sm:$0xff] %vm1606_vm8, %v1557_v48 }
 0x312   : > { %2021 = vst [vmem:[%s3638_s11 + $0x48] sm:$0xff] %v1989_v9 }
 0x313   : > { %v1887_v10 = vpop.f32.mrf.mxu0 }
 0x314   : > { %v1716_v60 = vpop.permute.xlu0 %1715  ;;  %v1888_v62 = vadd.f32 %v3628_v59, %v1887_v10  ;;  %v1732_v11 = vpop.permute.xlu1 %1731 }
 0x315   : > { %1806 = vst.msk [vmem:[#allocation2 + $0x30] sm:$0xff] %vm1799_vm9, %v1716_v60 }
 0x316   : > { %v1981_v12 = vmax.f32 %v1888_v62, 0.0  ;;  %1814 = vst.msk [vmem:[#allocation2 + $0x70] sm:$0xff] %vm1799_vm9, %v1732_v11 }
 0x318   : > { %2013 = vst [vmem:[%s3638_s11 + $0x8] sm:$0xff] %v1981_v12 }
 0x31c   : > { %v1573_v13 = vpop.permute.xlu0 %1572  ;;  %v1838_v58 = vld [vmem:[#allocation2 + $0x30] sm:$0xff]  ;;  %v1750_v44 = vpop.permute.xlu1 %1749 }
 0x31d   : > { %1638 = vst.msk [vmem:[#allocation2 + $0xf8] sm:$0xff] %vm1606_vm8, %v1573_v13  ;;  %1901 = vmatmul.f32.gmra.mxu0 %v1838_v58  ;;  %v1846_v14 = vld [vmem:[#allocation2 + $0x70] sm:$0xff] }
 0x31e   : > { %1823 = vst.msk [vmem:[#allocation2 + $0xb8] sm:$0xff] %vm1799_vm9, %v1750_v44  ;;  %1925 = vmatmul.f32.gmra.mxu1 %v1846_v14 }
 0x31f   : > { %1831 = vst.msk [vmem:[#allocation2 + $0xf8] sm:$0xff] %vm1799_vm9, %v1766_v53 }
 0x322   : > { %v1938_v3 = vpop.f32.mrf.mxu2 }
 0x323   : > { %v1939_v15 = vadd.f32 %v3628_v59, %v1938_v3 }
 0x324   : > { %v1525_v16 = vpop.permute.xlu0 %1524  ;;  %v1541_v17 = vpop.permute.xlu1 %1540 }
 0x325   : > { %1614 = vst.msk [vmem:[#allocation2 + $0x38] sm:$0xff] %vm1606_vm8, %v1525_v16  ;;  %v1998_v47 = vmax.f32 %v1939_v15, 0.0  ;;  %v1855_v19 = vld [vmem:[#allocation2 + $0xb8] sm:$0xff]  ;;  %v1890_v20 = vpop.f32.mrf.mxu0 }
 0x326   : > { %1622 = vst.msk [vmem:[#allocation2 + $0x78] sm:$0xff] %vm1606_vm8, %v1541_v17  ;;  %1952 = vmatmul.f32.gmra.mxu2 %v1855_v19  ;;  %v1863_v21 = vld [vmem:[#allocation2 + $0xf8] sm:$0xff]  ;;  %v1891_v22 = vadd.f32 %v3628_v59, %v1890_v20 }
 0x327   : > { %2030 = vst [vmem:[%s3638_s11 + $0x90] sm:$0xff] %v1998_v47  ;;  %1976 = vmatmul.f32.gmra.mxu3 %v1863_v21 }
 0x328   : > { %v1962_v23 = vpop.f32.mrf.mxu3  ;;  %1807 = vst.msk [vmem:[#allocation2 + $0x38] sm:$0xff] %vm1799_vm9, %v1718_v18  ;;  %v1982_v24 = vmax.f32 %v1891_v22, 0.0 }
 0x329   : > { %v1963_v25 = vadd.f32 %v3628_v59, %v1962_v23 }
 0x32a   : > { %2014 = vst [vmem:[%s3638_s11 + $0x10] sm:$0xff] %v1982_v24 }
 0x32b   : > { %v2006_v26 = vmax.f32 %v1963_v25, 0.0 }
 0x32c   : > { %v1734_v27 = vpop.permute.xlu0 %1733 }
 0x32d   : > { %2038 = vst [vmem:[%s3638_s11 + $0xd0] sm:$0xff] %v2006_v26 }
 0x32e   : > { %1815 = vst.msk [vmem:[#allocation2 + $0x78] sm:$0xff] %vm1799_vm9, %v1734_v27 }
 0x32f   : > { %v1839_v29 = vld [vmem:[#allocation2 + $0x38] sm:$0xff] }
 0x330   : > { %1904 = vmatmul.f32.gmra.mxu0 %v1839_v29 }
 0x332   : > { %v1914_v30 = vpop.f32.mrf.mxu1 }
 0x333   : > { %v1915_v36 = vadd.f32 %v3628_v59, %v1914_v30 }
 0x335   : > { %v1990_v31 = vmax.f32 %v1915_v36, 0.0  ;;  %v1847_v61 = vld [vmem:[#allocation2 + $0x78] sm:$0xff] }
 0x336   : > { %1928 = vmatmul.f32.gmra.mxu1 %v1847_v61 }
 0x337   : > { %2022 = vst [vmem:[%s3638_s11 + $0x50] sm:$0xff] %v1990_v31 }
 0x340   : > { %v1941_v52 = vpop.f32.mrf.mxu2 }
 0x341   : > { %v1942_v39 = vadd.f32 %v3628_v59, %v1941_v52  ;;  %v1965_v46 = vpop.f32.mrf.mxu3 }
 0x342   : > { %v1966_v32 = vadd.f32 %v3628_v59, %v1965_v46 }
 0x343   : > { %v1999_v45 = vmax.f32 %v1942_v39, 0.0 }
 0x344   : > { %v2007_v50 = vmax.f32 %v1966_v32, 0.0 }
 0x345   : > { %2031 = vst [vmem:[%s3638_s11 + $0x98] sm:$0xff] %v1999_v45 }
 0x346   : > { %2039 = vst [vmem:[%s3638_s11 + $0xd8] sm:$0xff] %v2007_v50 }
 0x34a   : > { %v1893_v42 = vpop.f32.mrf.mxu0 }
 0x34b   : > { %v1894_v56 = vadd.f32 %v3628_v59, %v1893_v42  ;;  %v1917_v34 = vpop.f32.mrf.mxu1 }
 0x34c   : > { %v1918_v38 = vadd.f32 %v3628_v59, %v1917_v34 }
 0x34d   : > { %v1983_v41 = vmax.f32 %v1894_v56, 0.0 }
 0x34e   : > { %v1991_v54 = vmax.f32 %v1918_v38, 0.0 }
 0x34f   : > { %2015 = vst [vmem:[%s3638_s11 + $0x18] sm:$0xff] %v1983_v41 }
 0x350   : > { %2023 = vst [vmem:[%s3638_s11 + $0x58] sm:$0xff] %v1991_v54 }
 0x359   : > { %v1944_v49 = vpop.f32.mrf.mxu2 }
 0x35a   : > { %v1945_v37 = vadd.f32 %v3628_v59, %v1944_v49  ;;  %v1968_v57 = vpop.f32.mrf.mxu3 }
 0x35b   : > { %v1969_v51 = vadd.f32 %v3628_v59, %v1968_v57 }
 0x35c   : > { %v2000_v1 = vmax.f32 %v1945_v37, 0.0  ;;  %v1920_v43 = vpop.f32.mrf.mxu1 }
 0x35d   : > { %v2008_v4 = vmax.f32 %v1969_v51, 0.0  ;;  %v1921_v28 = vadd.f32 %v3628_v59, %v1920_v43 }
 0x35e   : > { %2032 = vst [vmem:[%s3638_s11 + $0xa0] sm:$0xff] %v2000_v1 }
 0x35f   : > { %2040 = vst [vmem:[%s3638_s11 + $0xe0] sm:$0xff] %v2008_v4  ;;  %v1992_v2 = vmax.f32 %v1921_v28, 0.0 }
 0x361   : > { %2024 = vst [vmem:[%s3638_s11 + $0x60] sm:$0xff] %v1992_v2 }
 0x363   : > { %v1896_v63 = vpop.f32.mrf.mxu0 }
 0x364   : > { %v1897_v55 = vadd.f32 %v3628_v59, %v1896_v63 }
 0x366   : > { %v1984_v0 = vmax.f32 %v1897_v55, 0.0 }
 0x368   : > { %2016 = vst [vmem:[%s3638_s11 + $0x20] sm:$0xff] %v1984_v0 }
 0x372   : > { %v1947_v5 = vpop.f32.mrf.mxu2 }
 0x373   : > { %v1948_v6 = vadd.f32 %v3628_v59, %v1947_v5 }
 0x374   : > { %v1899_v35 = vpop.f32.mrf.mxu0 }
 0x375   : > { %v2001_v40 = vmax.f32 %v1948_v6, 0.0  ;;  %v1900_v7 = vadd.f32 %v3628_v59, %v1899_v35 }
 0x377   : > { %2033 = vst [vmem:[%s3638_s11 + $0xa8] sm:$0xff] %v2001_v40  ;;  %v1985_v8 = vmax.f32 %v1900_v7, 0.0 }
 0x378   : > { %v1971_v33 = vpop.f32.mrf.mxu3 }
 0x379   : > { %v1972_v48 = vadd.f32 %v3628_v59, %v1971_v33  ;;  %2017 = vst [vmem:[%s3638_s11 + $0x28] sm:$0xff] %v1985_v8 }
 0x37b   : > { %v2009_v9 = vmax.f32 %v1972_v48, 0.0 }
 0x37d   : > { %2041 = vst [vmem:[%s3638_s11 + $0xe8] sm:$0xff] %v2009_v9 }
 0x382   : > { %v1923_v10 = vpop.f32.mrf.mxu1 }
 0x383   : > { %v1924_v60 = vadd.f32 %v3628_v59, %v1923_v10 }
 0x385   : > { %v1993_v62 = vmax.f32 %v1924_v60, 0.0 }
 0x387   : > { %2025 = vst [vmem:[%s3638_s11 + $0x68] sm:$0xff] %v1993_v62 }
 0x390   : > { %v1950_v11 = vpop.f32.mrf.mxu2 }
 0x391   : > { %v1951_v12 = vadd.f32 %v3628_v59, %v1950_v11  ;;  %v1974_v53 = vpop.f32.mrf.mxu3 }
 0x392   : > { %v1975_v13 = vadd.f32 %v3628_v59, %v1974_v53 }
 0x393   : > { %v2002_v58 = vmax.f32 %v1951_v12, 0.0 }
 0x394   : > { %v2010_v44 = vmax.f32 %v1975_v13, 0.0 }
 0x395   : > { %2034 = vst [vmem:[%s3638_s11 + $0xb0] sm:$0xff] %v2002_v58 }
 0x396   : > { %2042 = vst [vmem:[%s3638_s11 + $0xf0] sm:$0xff] %v2010_v44 }
 0x39a   : > { %v1902_v14 = vpop.f32.mrf.mxu0 }
 0x39b   : > { %v1903_v3 = vadd.f32 %v3628_v59, %v1902_v14  ;;  %v1926_v15 = vpop.f32.mrf.mxu1 }
 0x39c   : > { %v1927_v16 = vadd.f32 %v3628_v59, %v1926_v15 }
 0x39d   : > { %v1986_v17 = vmax.f32 %v1903_v3, 0.0 }
 0x39e   : > { %v1994_v47 = vmax.f32 %v1927_v16, 0.0 }
 0x39f   : > { %2018 = vst [vmem:[%s3638_s11 + $0x30] sm:$0xff] %v1986_v17 }
 0x3a0   : > { %2026 = vst [vmem:[%s3638_s11 + $0x70] sm:$0xff] %v1994_v47 }
 0x3a9   : > { %v1953_v18 = vpop.f32.mrf.mxu2 }
 0x3aa   : > { %v1954_v19 = vadd.f32 %v3628_v59, %v1953_v18  ;;  %v1977_v20 = vpop.f32.mrf.mxu3 }
 0x3ab   : > { %v1978_v21 = vadd.f32 %v3628_v59, %v1977_v20 }
 0x3ac   : > { %v2003_v22 = vmax.f32 %v1954_v19, 0.0 }
 0x3ad   : > { %v2011_v23 = vmax.f32 %v1978_v21, 0.0  ;;  %v1905_v24 = vpop.f32.mrf.mxu0 }
 0x3ae   : > { %2035 = vst [vmem:[%s3638_s11 + $0xb8] sm:$0xff] %v2003_v22  ;;  %v1906_v25 = vadd.f32 %v3628_v59, %v1905_v24 }
 0x3af   : > { %2043 = vst [vmem:[%s3638_s11 + $0xf8] sm:$0xff] %v2011_v23 }
 0x3b0   : > { %v1987_v26 = vmax.f32 %v1906_v25, 0.0 }
 0x3b2   : > { %2019 = vst [vmem:[%s3638_s11 + $0x38] sm:$0xff] %v1987_v26 }
 0x3b3   : > { %v1929_v27 = vpop.f32.mrf.mxu1 }
 0x3b4   : > { %v1930_v29 = vadd.f32 %v3628_v59, %v1929_v27 }
 0x3b6   : > { %v1995_v30 = vmax.f32 %v1930_v29, 0.0 }
 0x3b8   : > { %2027 = vst [vmem:[%s3638_s11 + $0x78] sm:$0xff] %v1995_v30 }
 0x3b9 PF: > { %s13_s12 = sadd.s32 1, %s2375_s12  }
 0x3ba   : > { %p10_p4 = scmp.ge.s32.totalorder %s13_s12, 4  }
 0x3bc   :  { %12 = sbr.rel (!%p10_p4) target bundleno = 1 (0x1), region = 64 }

</bundles_post_ra>
